<compile_context>
chip_gen: v7x
topology: tpu7x:2x2x1
jax: 0.10.0
libtpu: 0.0.40
codegen_flags: <defaults>
</compile_context>

<pallas_src>
import functools

import jax
import jax.numpy as jnp
from jax import lax
from jax.experimental import pallas as pl
from jax.experimental.pallas import tpu as pltpu


# ----------------------------- model config ---------------------------------
CFG = dict(
    vocab=256,
    hidden=128,
    n_heads=4,
    head_dim=32,
    inter=256,
    n_layers=6,
    start_l=1,          # CQIL parallel section is layers [start_l, end_l)
    end_l=5,
    device_count=2,     # number of "ranks" the parallel layers are split over
    rope_base=10000.0,
    eps=1e-6,
)


# ----------------------------- Pallas kernel ---------------------------------
def _stack_kernel(first_ref, last_ref,                      # scalar-prefetch (SMEM)
                  x_in_ref, cos_ref, sin_ref, bias_ref, hmask_ref,
                  ln1_ref, wqkv_ref, wo_ref, ln2_ref, wgu_ref, wd_ref,
                  fnorm_ref, head_ref,
                  o_ref, x_sc, d_sc,
                  *, n_heads, head_dim, eps):
    """One grid step = one decoder layer (weights streamed over the layer axis).

    x_sc   : resident hidden state  [M, H] f32   (M = B*S rows)
    d_sc   : CQIL step delta accum  [M, H] f32
    Step semantics:  d += layer(x) - x ;  if last_in_step: x += d
    (sequential pre/post layers have first==last==1, i.e. 1-layer steps).
    Final grid step additionally applies RMSNorm + lm_head and writes o_ref.
    """
    l = pl.program_id(0)
    n_l = pl.num_programs(0)
    M, H = x_sc.shape
    D = head_dim
    scale = 1.0 / float(D) ** 0.5

    @pl.when(l == 0)
    def _():
        x_sc[...] = x_in_ref[...].astype(jnp.float32)

    @pl.when(first_ref[l] == 1)
    def _():
        d_sc[...] = jnp.zeros_like(d_sc)

    x = x_sc[...]                                   # [M, H] f32 (constant within a step)
    cos = cos_ref[...]                              # [M, H] f32, permuted-half layout
    sin = sin_ref[...]                              # [M, H] f32, rotate_half sign folded
    bias = bias_ref[...]                            # [M, M] f32, causal + same-sequence

    def rms(t, w):                                  # RMSNorm in f32 (VPU/EUP work)
        var = jnp.mean(t * t, axis=-1, keepdims=True)
        return t * lax.rsqrt(var + eps) * w

    # ---------------- self attention ----------------
    h = rms(x, ln1_ref[0]).astype(jnp.bfloat16)     # bf16 into the MXU
    qkv = jnp.dot(h, wqkv_ref[0], preferred_element_type=jnp.float32)   # [M, 3H]
    q = qkv[:, :H]
    k = qkv[:, H:2 * H]
    v = qkv[:, 2 * H:]

    # RoPE: with heads' half-dims made contiguous at pack time, rotate_half is a
    # full-width lane roll by H//2 (XLU), sign folded into the sin table.
    q = q * cos + pltpu.roll(q, shift=H // 2, axis=1) * sin
    k = k * cos + pltpu.roll(k, shift=H // 2, axis=1) * sin
    kb = k.astype(jnp.bfloat16)
    vb = v.astype(jnp.bfloat16)

    attn = jnp.zeros((M, H), jnp.float32)           # lane-dense per-head accumulator
    for hh in range(n_heads):
        hm = hmask_ref[hh]                          # [1, H] f32 (permuted layout)
        qm = (q * hm).astype(jnp.bfloat16)          # restrict contraction to head hh
        s = lax.dot_general(qm, kb, (((1,), (1,)), ((), ())),
                            preferred_element_type=jnp.float32) * scale + bias
        m = jnp.max(s, axis=-1, keepdims=True)      # softmax kept in f32
        p = jnp.exp(s - m)
        p = p * pl.reciprocal(jnp.sum(p, axis=-1, keepdims=True), approx=True)
        oh = jnp.dot(p.astype(jnp.bfloat16), vb, preferred_element_type=jnp.float32)
        attn = attn + oh * hm                       # independent masked add (no select chain)
    x1 = x + jnp.dot(attn.astype(jnp.bfloat16), wo_ref[0],
                     preferred_element_type=jnp.float32)

    # ---------------- MLP (fused gate/up + SiLU + down) ----------------
    hm2 = rms(x1, ln2_ref[0]).astype(jnp.bfloat16)
    gu = jnp.dot(hm2, wgu_ref[0], preferred_element_type=jnp.float32)   # [M, 2I]
    inter = wgu_ref.shape[-1] // 2
    g = gu[:, :inter]
    u = gu[:, inter:]
    act = (g * jax.nn.sigmoid(g) * u).astype(jnp.bfloat16)              # silu(g)*u
    y = x1 + jnp.dot(act, wd_ref[0], preferred_element_type=jnp.float32)

    # ---------------- CQIL delta accumulation / step flush ----------------
    d_sc[...] = d_sc[...] + (y - x)

    @pl.when(last_ref[l] == 1)
    def _():
        x_sc[...] = x_sc[...] + d_sc[...]           # x + sum_r (layer_r(x) - x)

    # ---------------- final RMSNorm + lm_head on the last step ----------------
    @pl.when(l == n_l - 1)
    def _():
        xf = x_sc[...]
        hf = rms(xf, fnorm_ref[...]).astype(jnp.bfloat16)
        o_ref[...] = jnp.dot(hf, head_ref[...],
                             preferred_element_type=jnp.float32).astype(o_ref.dtype)


# ----------------------------- pallas_call wrapper ---------------------------
def cqil_stack(x2, cos_f, sin_f, bias, packed, cfg):
    """x2: [M, H] hidden states -> logits [M, V] through the whole layer stack."""
    H, I, V = cfg["hidden"], cfg["inter"], cfg["vocab"]
    nh, D = cfg["n_heads"], cfg["head_dim"]
    L = packed["wqkv"].shape[0]
    M = x2.shape[0]

    kern = functools.partial(_stack_kernel, n_heads=nh, head_dim=D, eps=cfg["eps"])
    return pl.pallas_call(
        kern,
        out_shape=jax.ShapeDtypeStruct((M, V), jnp.float32),
        grid_spec=pltpu.PrefetchScalarGridSpec(
            num_scalar_prefetch=2,                  # first/last-in-step flags -> SMEM
            grid=(L,),                              # stream layers; weights prefetched
            in_specs=[
                pl.BlockSpec((M, H), lambda l, f, g: (0, 0)),            # x (resident)
                pl.BlockSpec((M, H), lambda l, f, g: (0, 0)),            # cos table
                pl.BlockSpec((M, H), lambda l, f, g: (0, 0)),            # signed sin table
                pl.BlockSpec((M, M), lambda l, f, g: (0, 0)),            # attn bias
                pl.BlockSpec((nh, 1, H), lambda l, f, g: (0, 0, 0)),     # head masks
                pl.BlockSpec((1, 1, H), lambda l, f, g: (l, 0, 0)),      # ln1     (streamed)
                pl.BlockSpec((1, H, 3 * H), lambda l, f, g: (l, 0, 0)),  # wqkv    (streamed)
                pl.BlockSpec((1, H, H), lambda l, f, g: (l, 0, 0)),      # wo      (streamed)
                pl.BlockSpec((1, 1, H), lambda l, f, g: (l, 0, 0)),      # ln2     (streamed)
                pl.BlockSpec((1, H, 2 * I), lambda l, f, g: (l, 0, 0)),  # wg|wu   (streamed)
                pl.BlockSpec((1, I, H), lambda l, f, g: (l, 0, 0)),      # wd      (streamed)
                pl.BlockSpec((1, H), lambda l, f, g: (0, 0)),            # final norm
                pl.BlockSpec((H, V), lambda l, f, g: (0, 0)),            # lm_head
            ],
            out_specs=pl.BlockSpec((M, V), lambda l, f, g: (0, 0)),      # logits (written last step)
            scratch_shapes=[pltpu.VMEM((M, H), jnp.float32),             # x
                            pltpu.VMEM((M, H), jnp.float32)],            # CQIL delta
        ),
        compiler_params=pltpu.CompilerParams(dimension_semantics=("arbitrary",)),
    )(packed["first"], packed["last"], x2, cos_f, sin_f, bias, packed["hmask"],
      packed["ln1"], packed["wqkv"], packed["wo"], packed["ln2"],
      packed["wgu"], packed["wd"], packed["final_norm"], packed["lm_head"])


# ----------------------------- JAX glue ---------------------------------------
def rope_tables_perm(B, S, n_heads, head_dim, base):
    """[B*S, H] cos / sign-folded sin tables in the permuted half-dim layout."""
    half = head_dim // 2
    pos = jnp.arange(S, dtype=jnp.float32)
    inv_freq = 1.0 / (base ** (jnp.arange(half, dtype=jnp.float32) * 2.0 / head_dim))
    f = pos[:, None] * inv_freq[None, :]                       # [S, D/2]
    cos = jnp.tile(jnp.cos(f), (1, n_heads))                   # [S, H/2]
    sin = jnp.tile(jnp.sin(f), (1, n_heads))
    cos_full = jnp.concatenate([cos, cos], axis=1)             # [S, H]
    sin_full = jnp.concatenate([-sin, sin], axis=1)            # rotate_half sign folded
    return jnp.tile(cos_full, (B, 1)), jnp.tile(sin_full, (B, 1))   # [B*S, H]


def causal_block_bias(B, S):
    """Additive mask: 0 where (same sequence AND causal), -1e30 elsewhere."""
    M = B * S
    r = jnp.arange(M)
    same_seq = (r[:, None] // S) == (r[None, :] // S)
    causal = r[None, :] <= r[:, None]
    return jnp.where(same_seq & causal, 0.0, -1e30).astype(jnp.float32)


def cqil_forward(token_ids, packed, cfg):
    """CQILWrapper.forward: returns (logits,) with logits [B, S, vocab]."""
    B, S = token_ids.shape
    H, V = cfg["hidden"], cfg["vocab"]
    x = jnp.take(packed["embed"], token_ids, axis=0)           # embedding gather (XLA glue)
    x2 = x.reshape(B * S, H).astype(jnp.float32)
    cos_f, sin_f = rope_tables_perm(B, S, cfg["n_heads"], cfg["head_dim"],
                                    cfg["rope_base"])
    bias = causal_block_bias(B, S)
    logits2 = cqil_stack(x2, cos_f, sin_f, bias, packed, cfg)
    return (logits2.reshape(B, S, V),)


# ----------------------------- params ----------------------------------------
def init_params(key, cfg):
    H, I, V = cfg["hidden"], cfg["inter"], cfg["vocab"]
    n_layers = cfg["n_layers"]

    def nrm(k, shape, scale=0.02):
        return scale * jax.random.normal(k, shape, dtype=jnp.float32)

    keys = jax.random.split(key, 2 + n_layers)
    params = {
        "embed": nrm(keys[0], (V, H)),
        "lm_head": nrm(keys[1], (H, V)),
        "final_norm": jnp.ones((H,), jnp.float32),
        "layers": [],
    }
    for li in range(n_layers):
        lk = jax.random.split(keys[2 + li], 7)
        params["layers"].append({
            "ln1": jnp.ones((H,), jnp.float32),
            "wq": nrm(lk[0], (H, H)),
            "wk": nrm(lk[1], (H, H)),
            "wv": nrm(lk[2], (H, H)),
            "wo": nrm(lk[3], (H, H)),
            "ln2": jnp.ones((H,), jnp.float32),
            "wg": nrm(lk[4], (H, I)),
            "wu": nrm(lk[5], (H, I)),
            "wd": nrm(lk[6], (I, H)),
        })
    return params


def pack_params(params, cfg):
    """Fold per-layer weights into streamed/stacked bf16 form (done once, outside jit).

    * wq|wk|wv -> wqkv [L,H,3H], wg|wu -> wgu [L,H,2I]; all matmul weights bf16.
    * q/k/v output columns and wo rows are permuted so every head's first half-dims
      are contiguous -> in-kernel rotate_half == pltpu.roll(.., H//2).
    * first/last flags mark CQIL-step boundaries (sequential layers = 1-layer steps).
    """
    H, I, D = cfg["hidden"], cfg["inter"], cfg["head_dim"]
    nh, L = cfg["n_heads"], cfg["n_layers"]
    start_l, end_l, dc = cfg["start_l"], cfg["end_l"], cfg["device_count"]
    assert (end_l - start_l) % dc == 0
    half = D // 2

    perm = jnp.concatenate(
        [jnp.arange(h * D, h * D + half) for h in range(nh)]
        + [jnp.arange(h * D + half, (h + 1) * D) for h in range(nh)])

    ln1, wqkv, wo, ln2, wgu, wd = [], [], [], [], [], []
    for lp in params["layers"]:
        ln1.append(lp["ln1"].reshape(1, H))
        wqkv.append(jnp.concatenate(
            [lp["wq"][:, perm], lp["wk"][:, perm], lp["wv"][:, perm]], axis=1))
        wo.append(lp["wo"][perm, :])
        ln2.append(lp["ln2"].reshape(1, H))
        wgu.append(jnp.concatenate([lp["wg"], lp["wu"]], axis=1))
        wd.append(lp["wd"])

    first, last = [], []
    for l in range(L):
        if start_l <= l < end_l:
            k = (l - start_l) % dc
            first.append(1 if k == 0 else 0)
            last.append(1 if k == dc - 1 else 0)
        else:                                       # sequential pre/post layer
            first.append(1)
            last.append(1)

    lane = jnp.arange(H)
    head_of_lane = (lane % (H // 2)) // half        # head id in permuted layout
    hmask = (head_of_lane[None, :] == jnp.arange(nh)[:, None]).astype(jnp.float32)

    bf = jnp.bfloat16
    return {
        "embed": params["embed"],
        "first": jnp.array(first, jnp.int32),
        "last": jnp.array(last, jnp.int32),
        "ln1": jnp.stack(ln1),                      # [L,1,H]  f32
        "wqkv": jnp.stack(wqkv).astype(bf),         # [L,H,3H] bf16
        "wo": jnp.stack(wo).astype(bf),             # [L,H,H]  bf16
        "ln2": jnp.stack(ln2),                      # [L,1,H]  f32
        "wgu": jnp.stack(wgu).astype(bf),           # [L,H,2I] bf16
        "wd": jnp.stack(wd).astype(bf),             # [L,I,H]  bf16
        "final_norm": params["final_norm"].reshape(1, H),
        "lm_head": params["lm_head"].astype(bf),    # [H,V]    bf16
        "hmask": hmask.reshape(nh, 1, H),           # [nh,1,H] f32
    }


# ----------------------------- main -------------------------------------------
if __name__ == "__main__":
    cfg = CFG
    key = jax.random.PRNGKey(0)
    pkey, tkey = jax.random.split(key)
    params = init_params(pkey, cfg)
    packed = pack_params(params, cfg)
    tokens = jax.random.randint(tkey, (2, 8), 0, cfg["vocab"], dtype=jnp.int32)

    fwd = jax.jit(functools.partial(cqil_forward, cfg=cfg))
    (logits,) = fwd(tokens, packed)
    jax.block_until_ready(logits)

    assert logits.shape == (2, 8, cfg["vocab"]), logits.shape
    assert bool(jnp.all(jnp.isfinite(logits)))
    print("KERNEL_OK")
</pallas_src>

<mosaic_0001>
module attributes {stable_mosaic.version = 11 : i64} {
  func.func @_stack_kernel(%arg0: i32, %arg1: memref<6xi32, #tpu.memory_space<smem>>, %arg2: memref<6xi32, #tpu.memory_space<smem>>, %arg3: memref<16x128xf32, #tpu.memory_space<vmem>>, %arg4: memref<16x128xf32, #tpu.memory_space<vmem>>, %arg5: memref<16x128xf32, #tpu.memory_space<vmem>>, %arg6: memref<16x16xf32, #tpu.memory_space<vmem>>, %arg7: memref<4x1x128xf32, #tpu.memory_space<vmem>>, %arg8: memref<1x1x128xf32, #tpu.memory_space<vmem>>, %arg9: memref<1x128x384xbf16, #tpu.memory_space<vmem>>, %arg10: memref<1x128x128xbf16, #tpu.memory_space<vmem>>, %arg11: memref<1x1x128xf32, #tpu.memory_space<vmem>>, %arg12: memref<1x128x512xbf16, #tpu.memory_space<vmem>>, %arg13: memref<1x256x128xbf16, #tpu.memory_space<vmem>>, %arg14: memref<1x128xf32, #tpu.memory_space<vmem>>, %arg15: memref<128x256xbf16, #tpu.memory_space<vmem>>, %arg16: memref<16x256xf32, #tpu.memory_space<vmem>>, %arg17: memref<16x128xf32, #tpu.memory_space<vmem>>, %arg18: memref<16x128xf32, #tpu.memory_space<vmem>>) attributes {dimension_semantics = [#tpu.dimension_semantics<arbitrary>], iteration_bounds = array<i64: 6>, scalar_prefetch = 2 : i64, scratch_operands = 2 : i64, tpu.core_type = #tpu.core_type<tc>, window_params = [{pipeline_mode = #tpu.pipeline_mode<synchronous>, transform_indices = @transform_0, window_bounds = array<i64: 16, 128>}, {pipeline_mode = #tpu.pipeline_mode<synchronous>, transform_indices = @transform_1, window_bounds = array<i64: 16, 128>}, {pipeline_mode = #tpu.pipeline_mode<synchronous>, transform_indices = @transform_2, window_bounds = array<i64: 16, 128>}, {pipeline_mode = #tpu.pipeline_mode<synchronous>, transform_indices = @transform_3, window_bounds = array<i64: 16, 16>}, {pipeline_mode = #tpu.pipeline_mode<synchronous>, transform_indices = @transform_4, window_bounds = array<i64: 4, 1, 128>}, {transform_indices = @transform_5, window_bounds = array<i64: 1, 1, 128>}, {transform_indices = @transform_6, window_bounds = array<i64: 1, 128, 384>}, {transform_indices = @transform_7, window_bounds = array<i64: 1, 128, 128>}, {transform_indices = @transform_8, window_bounds = array<i64: 1, 1, 128>}, {transform_indices = @transform_9, window_bounds = array<i64: 1, 128, 512>}, {transform_indices = @transform_10, window_bounds = array<i64: 1, 256, 128>}, {pipeline_mode = #tpu.pipeline_mode<synchronous>, transform_indices = @transform_11, window_bounds = array<i64: 1, 128>}, {pipeline_mode = #tpu.pipeline_mode<synchronous>, transform_indices = @transform_12, window_bounds = array<i64: 128, 256>}, {pipeline_mode = #tpu.pipeline_mode<synchronous>, transform_indices = @transform_13, window_bounds = array<i64: 16, 256>}]} {
    %c0_i32 = arith.constant 0 : i32
    %0 = arith.cmpi eq, %arg0, %c0_i32 : i32
    %1 = arith.extui %0 : i1 to i32
    %c0_i32_0 = arith.constant 0 : i32
    %2 = arith.cmpi ne, %1, %c0_i32_0 : i32
    scf.if %2 {
      %c0_75 = arith.constant 0 : index
      %c0_76 = arith.constant 0 : index
      %189 = vector.load %arg3[%c0_75, %c0_76] : memref<16x128xf32, #tpu.memory_space<vmem>>, vector<16x128xf32>
      %c0_77 = arith.constant 0 : index
      %c0_78 = arith.constant 0 : index
      %190 = vector.load %arg17[%c0_77, %c0_78] : memref<16x128xf32, #tpu.memory_space<vmem>>, vector<16x128xf32>
      tpu.vector_store %arg17[%c0_77, %c0_78], %189 {strides = array<i32>} : memref<16x128xf32, #tpu.memory_space<vmem>>, vector<16x128xf32>,
    } else {
    }
    %3 = arith.index_cast %arg0 : i32 to index
    %4 = memref.load %arg1[%3] : memref<6xi32, #tpu.memory_space<smem>>
    %c1_i32 = arith.constant 1 : i32
    %5 = arith.cmpi eq, %4, %c1_i32 : i32
    %6 = arith.extui %5 : i1 to i32
    %c0_i32_1 = arith.constant 0 : i32
    %7 = arith.cmpi ne, %6, %c0_i32_1 : i32
    scf.if %7 {
      %cst_75 = arith.constant 0.000000e+00 : f32
      %189 = vector.broadcast %cst_75 : f32 to vector<16x128xf32>
      %c0_76 = arith.constant 0 : index
      %c0_77 = arith.constant 0 : index
      %190 = vector.load %arg18[%c0_76, %c0_77] : memref<16x128xf32, #tpu.memory_space<vmem>>, vector<16x128xf32>
      tpu.vector_store %arg18[%c0_76, %c0_77], %189 {strides = array<i32>} : memref<16x128xf32, #tpu.memory_space<vmem>>, vector<16x128xf32>,
    } else {
    }
    %c0 = arith.constant 0 : index
    %c0_2 = arith.constant 0 : index
    %8 = vector.load %arg17[%c0, %c0_2] : memref<16x128xf32, #tpu.memory_space<vmem>>, vector<16x128xf32>
    %c0_3 = arith.constant 0 : index
    %c0_4 = arith.constant 0 : index
    %9 = vector.load %arg4[%c0_3, %c0_4] : memref<16x128xf32, #tpu.memory_space<vmem>>, vector<16x128xf32>
    %c0_5 = arith.constant 0 : index
    %c0_6 = arith.constant 0 : index
    %10 = vector.load %arg5[%c0_5, %c0_6] : memref<16x128xf32, #tpu.memory_space<vmem>>, vector<16x128xf32>
    %c0_7 = arith.constant 0 : index
    %c0_8 = arith.constant 0 : index
    %11 = vector.load %arg6[%c0_7, %c0_8] : memref<16x16xf32, #tpu.memory_space<vmem>>, vector<16x16xf32>
    %c0_9 = arith.constant 0 : index
    %c0_10 = arith.constant 0 : index
    %c0_11 = arith.constant 0 : index
    %12 = vector.load %arg8[%c0_9, %c0_10, %c0_11] : memref<1x1x128xf32, #tpu.memory_space<vmem>>, vector<1x1x128xf32>
    %13 = vector.shape_cast %12 : vector<1x1x128xf32> to vector<1x128xf32>
    %14 = arith.mulf %8, %8 : vector<16x128xf32>
    %cst = arith.constant dense<0.000000e+00> : vector<16xf32>
    %15 = vector.multi_reduction <add>, %14, %cst [1] : vector<16x128xf32> to vector<16xf32>
    %16 = vector.shape_cast %15 : vector<16xf32> to vector<16x1xf32>
    %cst_12 = arith.constant 1.280000e+02 : f32
    %17 = vector.broadcast %cst_12 : f32 to vector<16x1xf32>
    %18 = arith.divf %16, %17 : vector<16x1xf32>
    %cst_13 = arith.constant 9.99999997E-7 : f32
    %19 = vector.broadcast %cst_13 : f32 to vector<16x1xf32>
    %20 = arith.addf %18, %19 : vector<16x1xf32>
    %21 = math.rsqrt %20 : vector<16x1xf32>
    %22 = vector.broadcast %21 : vector<16x1xf32> to vector<16x128xf32>
    %23 = arith.mulf %8, %22 : vector<16x128xf32>
    %24 = vector.broadcast %13 : vector<1x128xf32> to vector<16x128xf32>
    %25 = arith.mulf %23, %24 : vector<16x128xf32>
    %26 = arith.truncf %25 : vector<16x128xf32> to vector<16x128xbf16>
    %c0_14 = arith.constant 0 : index
    %c0_15 = arith.constant 0 : index
    %c0_16 = arith.constant 0 : index
    %27 = vector.load %arg9[%c0_14, %c0_15, %c0_16] : memref<1x128x384xbf16, #tpu.memory_space<vmem>>, vector<1x128x384xbf16>
    %28 = vector.shape_cast %27 : vector<1x128x384xbf16> to vector<128x384xbf16>
    %cst_17 = arith.constant dense<0.000000e+00> : vector<16x384xf32>
    %29 = tpu.matmul %26, %28, %cst_17 {dimension_numbers = #tpu.dot_dimension_numbers<[1], [0], [0], [1], [0, 0, 1, 1], [], []>} : vector<16x128xbf16>, vector<128x384xbf16>, vector<16x384xf32> -> vector<16x384xf32>
    %30 = vector.extract_strided_slice %29 {offsets = [0, 0], sizes = [16, 128], strides = [1, 1]} : vector<16x384xf32> to vector<16x128xf32>
    %31 = vector.extract_strided_slice %29 {offsets = [0, 128], sizes = [16, 128], strides = [1, 1]} : vector<16x384xf32> to vector<16x128xf32>
    %32 = vector.extract_strided_slice %29 {offsets = [0, 256], sizes = [16, 128], strides = [1, 1]} : vector<16x384xf32> to vector<16x128xf32>
    %33 = arith.mulf %30, %9 : vector<16x128xf32>
    %c64_i32 = arith.constant 64 : i32
    %34 = tpu.dynamic_rotate %30 by %c64_i32 dim 1 : vector<16x128xf32>, i32 -> vector<16x128xf32>
    %35 = arith.mulf %34, %10 : vector<16x128xf32>
    %36 = arith.addf %33, %35 : vector<16x128xf32>
    %37 = arith.mulf %31, %9 : vector<16x128xf32>
    %c64_i32_18 = arith.constant 64 : i32
    %38 = tpu.dynamic_rotate %31 by %c64_i32_18 dim 1 : vector<16x128xf32>, i32 -> vector<16x128xf32>
    %39 = arith.mulf %38, %10 : vector<16x128xf32>
    %40 = arith.addf %37, %39 : vector<16x128xf32>
    %41 = arith.truncf %40 : vector<16x128xf32> to vector<16x128xbf16>
    %42 = arith.truncf %32 : vector<16x128xf32> to vector<16x128xbf16>
    %cst_19 = arith.constant 0.000000e+00 : f32
    %43 = vector.broadcast %cst_19 : f32 to vector<16x128xf32>
    %c0_20 = arith.constant 0 : index
    %c0_21 = arith.constant 0 : index
    %c0_22 = arith.constant 0 : index
    %44 = vector.load %arg7[%c0_20, %c0_21, %c0_22] : memref<4x1x128xf32, #tpu.memory_space<vmem>>, vector<1x1x128xf32>
    %45 = vector.shape_cast %44 : vector<1x1x128xf32> to vector<1x128xf32>
    %46 = vector.broadcast %45 : vector<1x128xf32> to vector<16x128xf32>
    %47 = arith.mulf %36, %46 : vector<16x128xf32>
    %48 = arith.truncf %47 : vector<16x128xf32> to vector<16x128xbf16>
    %cst_23 = arith.constant dense<0.000000e+00> : vector<16x16xf32>
    %49 = tpu.matmul %48, %41, %cst_23 {dimension_numbers = #tpu.dot_dimension_numbers<[1], [1], [0], [0], [0, 0, 1, 0], [], []>} : vector<16x128xbf16>, vector<16x128xbf16>, vector<16x16xf32> -> vector<16x16xf32>
    %cst_24 = arith.constant 0.176776692 : f32
    %50 = vector.broadcast %cst_24 : f32 to vector<16x16xf32>
    %51 = arith.mulf %49, %50 : vector<16x16xf32>
    %52 = arith.addf %51, %11 : vector<16x16xf32>
    %cst_25 = arith.constant dense<0xFF800000> : vector<16xf32>
    %53 = vector.multi_reduction <maximumf>, %52, %cst_25 [1] : vector<16x16xf32> to vector<16xf32>
    %54 = vector.shape_cast %53 : vector<16xf32> to vector<16x1xf32>
    %55 = vector.broadcast %54 : vector<16x1xf32> to vector<16x16xf32>
    %56 = arith.subf %52, %55 : vector<16x16xf32>
    %57 = math.exp %56 : vector<16x16xf32>
    %cst_26 = arith.constant dense<0.000000e+00> : vector<16xf32>
    %58 = vector.multi_reduction <add>, %57, %cst_26 [1] : vector<16x16xf32> to vector<16xf32>
    %59 = vector.shape_cast %58 : vector<16xf32> to vector<16x1xf32>
    %60 = tpu.reciprocal %59 {approx = true} : vector<16x1xf32> -> vector<16x1xf32>
    %61 = vector.broadcast %60 : vector<16x1xf32> to vector<16x16xf32>
    %62 = arith.mulf %57, %61 : vector<16x16xf32>
    %63 = arith.truncf %62 : vector<16x16xf32> to vector<16x16xbf16>
    %cst_27 = arith.constant dense<0.000000e+00> : vector<16x128xf32>
    %64 = tpu.matmul %63, %42, %cst_27 {dimension_numbers = #tpu.dot_dimension_numbers<[1], [0], [0], [1], [0, 0, 1, 1], [], []>} : vector<16x16xbf16>, vector<16x128xbf16>, vector<16x128xf32> -> vector<16x128xf32>
    %65 = vector.broadcast %45 : vector<1x128xf32> to vector<16x128xf32>
    %66 = arith.mulf %64, %65 : vector<16x128xf32>
    %67 = arith.addf %43, %66 : vector<16x128xf32>
    %c1 = arith.constant 1 : index
    %c0_28 = arith.constant 0 : index
    %c0_29 = arith.constant 0 : index
    %68 = vector.load %arg7[%c1, %c0_28, %c0_29] : memref<4x1x128xf32, #tpu.memory_space<vmem>>, vector<1x1x128xf32>
    %69 = vector.shape_cast %68 : vector<1x1x128xf32> to vector<1x128xf32>
    %70 = vector.broadcast %69 : vector<1x128xf32> to vector<16x128xf32>
    %71 = arith.mulf %36, %70 : vector<16x128xf32>
    %72 = arith.truncf %71 : vector<16x128xf32> to vector<16x128xbf16>
    %cst_30 = arith.constant dense<0.000000e+00> : vector<16x16xf32>
    %73 = tpu.matmul %72, %41, %cst_30 {dimension_numbers = #tpu.dot_dimension_numbers<[1], [1], [0], [0], [0, 0, 1, 0], [], []>} : vector<16x128xbf16>, vector<16x128xbf16>, vector<16x16xf32> -> vector<16x16xf32>
    %cst_31 = arith.constant 0.176776692 : f32
    %74 = vector.broadcast %cst_31 : f32 to vector<16x16xf32>
    %75 = arith.mulf %73, %74 : vector<16x16xf32>
    %76 = arith.addf %75, %11 : vector<16x16xf32>
    %cst_32 = arith.constant dense<0xFF800000> : vector<16xf32>
    %77 = vector.multi_reduction <maximumf>, %76, %cst_32 [1] : vector<16x16xf32> to vector<16xf32>
    %78 = vector.shape_cast %77 : vector<16xf32> to vector<16x1xf32>
    %79 = vector.broadcast %78 : vector<16x1xf32> to vector<16x16xf32>
    %80 = arith.subf %76, %79 : vector<16x16xf32>
    %81 = math.exp %80 : vector<16x16xf32>
    %cst_33 = arith.constant dense<0.000000e+00> : vector<16xf32>
    %82 = vector.multi_reduction <add>, %81, %cst_33 [1] : vector<16x16xf32> to vector<16xf32>
    %83 = vector.shape_cast %82 : vector<16xf32> to vector<16x1xf32>
    %84 = tpu.reciprocal %83 {approx = true} : vector<16x1xf32> -> vector<16x1xf32>
    %85 = vector.broadcast %84 : vector<16x1xf32> to vector<16x16xf32>
    %86 = arith.mulf %81, %85 : vector<16x16xf32>
    %87 = arith.truncf %86 : vector<16x16xf32> to vector<16x16xbf16>
    %cst_34 = arith.constant dense<0.000000e+00> : vector<16x128xf32>
    %88 = tpu.matmul %87, %42, %cst_34 {dimension_numbers = #tpu.dot_dimension_numbers<[1], [0], [0], [1], [0, 0, 1, 1], [], []>} : vector<16x16xbf16>, vector<16x128xbf16>, vector<16x128xf32> -> vector<16x128xf32>
    %89 = vector.broadcast %69 : vector<1x128xf32> to vector<16x128xf32>
    %90 = arith.mulf %88, %89 : vector<16x128xf32>
    %91 = arith.addf %67, %90 : vector<16x128xf32>
    %c2 = arith.constant 2 : index
    %c0_35 = arith.constant 0 : index
    %c0_36 = arith.constant 0 : index
    %92 = vector.load %arg7[%c2, %c0_35, %c0_36] : memref<4x1x128xf32, #tpu.memory_space<vmem>>, vector<1x1x128xf32>
    %93 = vector.shape_cast %92 : vector<1x1x128xf32> to vector<1x128xf32>
    %94 = vector.broadcast %93 : vector<1x128xf32> to vector<16x128xf32>
    %95 = arith.mulf %36, %94 : vector<16x128xf32>
    %96 = arith.truncf %95 : vector<16x128xf32> to vector<16x128xbf16>
    %cst_37 = arith.constant dense<0.000000e+00> : vector<16x16xf32>
    %97 = tpu.matmul %96, %41, %cst_37 {dimension_numbers = #tpu.dot_dimension_numbers<[1], [1], [0], [0], [0, 0, 1, 0], [], []>} : vector<16x128xbf16>, vector<16x128xbf16>, vector<16x16xf32> -> vector<16x16xf32>
    %cst_38 = arith.constant 0.176776692 : f32
    %98 = vector.broadcast %cst_38 : f32 to vector<16x16xf32>
    %99 = arith.mulf %97, %98 : vector<16x16xf32>
    %100 = arith.addf %99, %11 : vector<16x16xf32>
    %cst_39 = arith.constant dense<0xFF800000> : vector<16xf32>
    %101 = vector.multi_reduction <maximumf>, %100, %cst_39 [1] : vector<16x16xf32> to vector<16xf32>
    %102 = vector.shape_cast %101 : vector<16xf32> to vector<16x1xf32>
    %103 = vector.broadcast %102 : vector<16x1xf32> to vector<16x16xf32>
    %104 = arith.subf %100, %103 : vector<16x16xf32>
    %105 = math.exp %104 : vector<16x16xf32>
    %cst_40 = arith.constant dense<0.000000e+00> : vector<16xf32>
    %106 = vector.multi_reduction <add>, %105, %cst_40 [1] : vector<16x16xf32> to vector<16xf32>
    %107 = vector.shape_cast %106 : vector<16xf32> to vector<16x1xf32>
    %108 = tpu.reciprocal %107 {approx = true} : vector<16x1xf32> -> vector<16x1xf32>
    %109 = vector.broadcast %108 : vector<16x1xf32> to vector<16x16xf32>
    %110 = arith.mulf %105, %109 : vector<16x16xf32>
    %111 = arith.truncf %110 : vector<16x16xf32> to vector<16x16xbf16>
    %cst_41 = arith.constant dense<0.000000e+00> : vector<16x128xf32>
    %112 = tpu.matmul %111, %42, %cst_41 {dimension_numbers = #tpu.dot_dimension_numbers<[1], [0], [0], [1], [0, 0, 1, 1], [], []>} : vector<16x16xbf16>, vector<16x128xbf16>, vector<16x128xf32> -> vector<16x128xf32>
    %113 = vector.broadcast %93 : vector<1x128xf32> to vector<16x128xf32>
    %114 = arith.mulf %112, %113 : vector<16x128xf32>
    %115 = arith.addf %91, %114 : vector<16x128xf32>
    %c3 = arith.constant 3 : index
    %c0_42 = arith.constant 0 : index
    %c0_43 = arith.constant 0 : index
    %116 = vector.load %arg7[%c3, %c0_42, %c0_43] : memref<4x1x128xf32, #tpu.memory_space<vmem>>, vector<1x1x128xf32>
    %117 = vector.shape_cast %116 : vector<1x1x128xf32> to vector<1x128xf32>
    %118 = vector.broadcast %117 : vector<1x128xf32> to vector<16x128xf32>
    %119 = arith.mulf %36, %118 : vector<16x128xf32>
    %120 = arith.truncf %119 : vector<16x128xf32> to vector<16x128xbf16>
    %cst_44 = arith.constant dense<0.000000e+00> : vector<16x16xf32>
    %121 = tpu.matmul %120, %41, %cst_44 {dimension_numbers = #tpu.dot_dimension_numbers<[1], [1], [0], [0], [0, 0, 1, 0], [], []>} : vector<16x128xbf16>, vector<16x128xbf16>, vector<16x16xf32> -> vector<16x16xf32>
    %cst_45 = arith.constant 0.176776692 : f32
    %122 = vector.broadcast %cst_45 : f32 to vector<16x16xf32>
    %123 = arith.mulf %121, %122 : vector<16x16xf32>
    %124 = arith.addf %123, %11 : vector<16x16xf32>
    %cst_46 = arith.constant dense<0xFF800000> : vector<16xf32>
    %125 = vector.multi_reduction <maximumf>, %124, %cst_46 [1] : vector<16x16xf32> to vector<16xf32>
    %126 = vector.shape_cast %125 : vector<16xf32> to vector<16x1xf32>
    %127 = vector.broadcast %126 : vector<16x1xf32> to vector<16x16xf32>
    %128 = arith.subf %124, %127 : vector<16x16xf32>
    %129 = math.exp %128 : vector<16x16xf32>
    %cst_47 = arith.constant dense<0.000000e+00> : vector<16xf32>
    %130 = vector.multi_reduction <add>, %129, %cst_47 [1] : vector<16x16xf32> to vector<16xf32>
    %131 = vector.shape_cast %130 : vector<16xf32> to vector<16x1xf32>
    %132 = tpu.reciprocal %131 {approx = true} : vector<16x1xf32> -> vector<16x1xf32>
    %133 = vector.broadcast %132 : vector<16x1xf32> to vector<16x16xf32>
    %134 = arith.mulf %129, %133 : vector<16x16xf32>
    %135 = arith.truncf %134 : vector<16x16xf32> to vector<16x16xbf16>
    %cst_48 = arith.constant dense<0.000000e+00> : vector<16x128xf32>
    %136 = tpu.matmul %135, %42, %cst_48 {dimension_numbers = #tpu.dot_dimension_numbers<[1], [0], [0], [1], [0, 0, 1, 1], [], []>} : vector<16x16xbf16>, vector<16x128xbf16>, vector<16x128xf32> -> vector<16x128xf32>
    %137 = vector.broadcast %117 : vector<1x128xf32> to vector<16x128xf32>
    %138 = arith.mulf %136, %137 : vector<16x128xf32>
    %139 = arith.addf %115, %138 : vector<16x128xf32>
    %140 = arith.truncf %139 : vector<16x128xf32> to vector<16x128xbf16>
    %c0_49 = arith.constant 0 : index
    %c0_50 = arith.constant 0 : index
    %c0_51 = arith.constant 0 : index
    %141 = vector.load %arg10[%c0_49, %c0_50, %c0_51] : memref<1x128x128xbf16, #tpu.memory_space<vmem>>, vector<1x128x128xbf16>
    %142 = vector.shape_cast %141 : vector<1x128x128xbf16> to vector<128x128xbf16>
    %cst_52 = arith.constant dense<0.000000e+00> : vector<16x128xf32>
    %143 = tpu.matmul %140, %142, %cst_52 {dimension_numbers = #tpu.dot_dimension_numbers<[1], [0], [0], [1], [0, 0, 1, 1], [], []>} : vector<16x128xbf16>, vector<128x128xbf16>, vector<16x128xf32> -> vector<16x128xf32>
    %144 = arith.addf %8, %143 : vector<16x128xf32>
    %c0_53 = arith.constant 0 : index
    %c0_54 = arith.constant 0 : index
    %c0_55 = arith.constant 0 : index
    %145 = vector.load %arg11[%c0_53, %c0_54, %c0_55] : memref<1x1x128xf32, #tpu.memory_space<vmem>>, vector<1x1x128xf32>
    %146 = vector.shape_cast %145 : vector<1x1x128xf32> to vector<1x128xf32>
    %147 = arith.mulf %144, %144 : vector<16x128xf32>
    %cst_56 = arith.constant dense<0.000000e+00> : vector<16xf32>
    %148 = vector.multi_reduction <add>, %147, %cst_56 [1] : vector<16x128xf32> to vector<16xf32>
    %149 = vector.shape_cast %148 : vector<16xf32> to vector<16x1xf32>
    %cst_57 = arith.constant 1.280000e+02 : f32
    %150 = vector.broadcast %cst_57 : f32 to vector<16x1xf32>
    %151 = arith.divf %149, %150 : vector<16x1xf32>
    %cst_58 = arith.constant 9.99999997E-7 : f32
    %152 = vector.broadcast %cst_58 : f32 to vector<16x1xf32>
    %153 = arith.addf %151, %152 : vector<16x1xf32>
    %154 = math.rsqrt %153 : vector<16x1xf32>
    %155 = vector.broadcast %154 : vector<16x1xf32> to vector<16x128xf32>
    %156 = arith.mulf %144, %155 : vector<16x128xf32>
    %157 = vector.broadcast %146 : vector<1x128xf32> to vector<16x128xf32>
    %158 = arith.mulf %156, %157 : vector<16x128xf32>
    %159 = arith.truncf %158 : vector<16x128xf32> to vector<16x128xbf16>
    %c0_59 = arith.constant 0 : index
    %c0_60 = arith.constant 0 : index
    %c0_61 = arith.constant 0 : index
    %160 = vector.load %arg12[%c0_59, %c0_60, %c0_61] : memref<1x128x512xbf16, #tpu.memory_space<vmem>>, vector<1x128x512xbf16>
    %161 = vector.shape_cast %160 : vector<1x128x512xbf16> to vector<128x512xbf16>
    %cst_62 = arith.constant dense<0.000000e+00> : vector<16x512xf32>
    %162 = tpu.matmul %159, %161, %cst_62 {dimension_numbers = #tpu.dot_dimension_numbers<[1], [0], [0], [1], [0, 0, 1, 1], [], []>} : vector<16x128xbf16>, vector<128x512xbf16>, vector<16x512xf32> -> vector<16x512xf32>
    %163 = vector.extract_strided_slice %162 {offsets = [0, 0], sizes = [16, 256], strides = [1, 1]} : vector<16x512xf32> to vector<16x256xf32>
    %164 = vector.extract_strided_slice %162 {offsets = [0, 256], sizes = [16, 256], strides = [1, 1]} : vector<16x512xf32> to vector<16x256xf32>
    %165 = arith.negf %163 : vector<16x256xf32>
    %166 = math.exp %165 : vector<16x256xf32>
    %cst_63 = arith.constant 1.000000e+00 : f32
    %167 = vector.broadcast %cst_63 : f32 to vector<16x256xf32>
    %168 = arith.addf %167, %166 : vector<16x256xf32>
    %169 = arith.divf %167, %168 : vector<16x256xf32>
    %170 = arith.mulf %163, %169 : vector<16x256xf32>
    %171 = arith.mulf %170, %164 : vector<16x256xf32>
    %172 = arith.truncf %171 : vector<16x256xf32> to vector<16x256xbf16>
    %c0_64 = arith.constant 0 : index
    %c0_65 = arith.constant 0 : index
    %c0_66 = arith.constant 0 : index
    %173 = vector.load %arg13[%c0_64, %c0_65, %c0_66] : memref<1x256x128xbf16, #tpu.memory_space<vmem>>, vector<1x256x128xbf16>
    %174 = vector.shape_cast %173 : vector<1x256x128xbf16> to vector<256x128xbf16>
    %cst_67 = arith.constant dense<0.000000e+00> : vector<16x128xf32>
    %175 = tpu.matmul %172, %174, %cst_67 {dimension_numbers = #tpu.dot_dimension_numbers<[1], [0], [0], [1], [0, 0, 1, 1], [], []>} : vector<16x256xbf16>, vector<256x128xbf16>, vector<16x128xf32> -> vector<16x128xf32>
    %176 = arith.addf %144, %175 : vector<16x128xf32>
    %c0_68 = arith.constant 0 : index
    %c0_69 = arith.constant 0 : index
    %177 = vector.load %arg18[%c0_68, %c0_69] : memref<16x128xf32, #tpu.memory_space<vmem>>, vector<16x128xf32>
    %178 = arith.subf %176, %8 : vector<16x128xf32>
    %179 = arith.addf %177, %178 : vector<16x128xf32>
    %c0_70 = arith.constant 0 : index
    %c0_71 = arith.constant 0 : index
    %180 = vector.load %arg18[%c0_70, %c0_71] : memref<16x128xf32, #tpu.memory_space<vmem>>, vector<16x128xf32>
    tpu.vector_store %arg18[%c0_70, %c0_71], %179 {strides = array<i32>} : memref<16x128xf32, #tpu.memory_space<vmem>>, vector<16x128xf32>,
    %181 = arith.index_cast %arg0 : i32 to index
    %182 = memref.load %arg2[%181] : memref<6xi32, #tpu.memory_space<smem>>
    %c1_i32_72 = arith.constant 1 : i32
    %183 = arith.cmpi eq, %182, %c1_i32_72 : i32
    %184 = arith.extui %183 : i1 to i32
    %c0_i32_73 = arith.constant 0 : i32
    %185 = arith.cmpi ne, %184, %c0_i32_73 : i32
    scf.if %185 {
      %c0_75 = arith.constant 0 : index
      %c0_76 = arith.constant 0 : index
      %189 = vector.load %arg17[%c0_75, %c0_76] : memref<16x128xf32, #tpu.memory_space<vmem>>, vector<16x128xf32>
      %c0_77 = arith.constant 0 : index
      %c0_78 = arith.constant 0 : index
      %190 = vector.load %arg18[%c0_77, %c0_78] : memref<16x128xf32, #tpu.memory_space<vmem>>, vector<16x128xf32>
      %191 = arith.addf %189, %190 : vector<16x128xf32>
      %c0_79 = arith.constant 0 : index
      %c0_80 = arith.constant 0 : index
      %192 = vector.load %arg17[%c0_79, %c0_80] : memref<16x128xf32, #tpu.memory_space<vmem>>, vector<16x128xf32>
      tpu.vector_store %arg17[%c0_79, %c0_80], %191 {strides = array<i32>} : memref<16x128xf32, #tpu.memory_space<vmem>>, vector<16x128xf32>,
    } else {
    }
    %c5_i32 = arith.constant 5 : i32
    %186 = arith.cmpi eq, %arg0, %c5_i32 : i32
    %187 = arith.extui %186 : i1 to i32
    %c0_i32_74 = arith.constant 0 : i32
    %188 = arith.cmpi ne, %187, %c0_i32_74 : i32
    scf.if %188 {
      %c0_75 = arith.constant 0 : index
      %c0_76 = arith.constant 0 : index
      %189 = vector.load %arg17[%c0_75, %c0_76] : memref<16x128xf32, #tpu.memory_space<vmem>>, vector<16x128xf32>
      %c0_77 = arith.constant 0 : index
      %c0_78 = arith.constant 0 : index
      %190 = vector.load %arg14[%c0_77, %c0_78] : memref<1x128xf32, #tpu.memory_space<vmem>>, vector<1x128xf32>
      %191 = arith.mulf %189, %189 : vector<16x128xf32>
      %cst_79 = arith.constant dense<0.000000e+00> : vector<16xf32>
      %192 = vector.multi_reduction <add>, %191, %cst_79 [1] : vector<16x128xf32> to vector<16xf32>
      %193 = vector.shape_cast %192 : vector<16xf32> to vector<16x1xf32>
      %cst_80 = arith.constant 1.280000e+02 : f32
      %194 = vector.broadcast %cst_80 : f32 to vector<16x1xf32>
      %195 = arith.divf %193, %194 : vector<16x1xf32>
      %cst_81 = arith.constant 9.99999997E-7 : f32
      %196 = vector.broadcast %cst_81 : f32 to vector<16x1xf32>
      %197 = arith.addf %195, %196 : vector<16x1xf32>
      %198 = math.rsqrt %197 : vector<16x1xf32>
      %199 = vector.broadcast %198 : vector<16x1xf32> to vector<16x128xf32>
      %200 = arith.mulf %189, %199 : vector<16x128xf32>
      %201 = vector.broadcast %190 : vector<1x128xf32> to vector<16x128xf32>
      %202 = arith.mulf %200, %201 : vector<16x128xf32>
      %203 = arith.truncf %202 : vector<16x128xf32> to vector<16x128xbf16>
      %c0_82 = arith.constant 0 : index
      %c0_83 = arith.constant 0 : index
      %204 = vector.load %arg15[%c0_82, %c0_83] : memref<128x256xbf16, #tpu.memory_space<vmem>>, vector<128x256xbf16>
      %cst_84 = arith.constant dense<0.000000e+00> : vector<16x256xf32>
      %205 = tpu.matmul %203, %204, %cst_84 {dimension_numbers = #tpu.dot_dimension_numbers<[1], [0], [0], [1], [0, 0, 1, 1], [], []>} : vector<16x128xbf16>, vector<128x256xbf16>, vector<16x256xf32> -> vector<16x256xf32>
      %c0_85 = arith.constant 0 : index
      %c0_86 = arith.constant 0 : index
      %206 = vector.load %arg16[%c0_85, %c0_86] : memref<16x256xf32, #tpu.memory_space<vmem>>, vector<16x256xf32>
      tpu.vector_store %arg16[%c0_85, %c0_86], %205 {strides = array<i32>} : memref<16x256xf32, #tpu.memory_space<vmem>>, vector<16x256xf32>,
    } else {
    }
    return
  }
  func.func @transform_0(%arg0: i32, %arg1: memref<6xi32, #tpu.memory_space<smem>>, %arg2: memref<6xi32, #tpu.memory_space<smem>>) -> (i32, i32) {
    %c0_i32 = arith.constant 0 : i32
    %c0_i32_0 = arith.constant 0 : i32
    %c0_i32_1 = arith.constant 0 : i32
    return %c0_i32, %c0_i32_0 : i32, i32
  }
  func.func @transform_1(%arg0: i32, %arg1: memref<6xi32, #tpu.memory_space<smem>>, %arg2: memref<6xi32, #tpu.memory_space<smem>>) -> (i32, i32) {
    %c0_i32 = arith.constant 0 : i32
    %c0_i32_0 = arith.constant 0 : i32
    %c0_i32_1 = arith.constant 0 : i32
    return %c0_i32, %c0_i32_0 : i32, i32
  }
  func.func @transform_2(%arg0: i32, %arg1: memref<6xi32, #tpu.memory_space<smem>>, %arg2: memref<6xi32, #tpu.memory_space<smem>>) -> (i32, i32) {
    %c0_i32 = arith.constant 0 : i32
    %c0_i32_0 = arith.constant 0 : i32
    %c0_i32_1 = arith.constant 0 : i32
    return %c0_i32, %c0_i32_0 : i32, i32
  }
  func.func @transform_3(%arg0: i32, %arg1: memref<6xi32, #tpu.memory_space<smem>>, %arg2: memref<6xi32, #tpu.memory_space<smem>>) -> (i32, i32) {
    %c0_i32 = arith.constant 0 : i32
    %c0_i32_0 = arith.constant 0 : i32
    %c0_i32_1 = arith.constant 0 : i32
    return %c0_i32, %c0_i32_0 : i32, i32
  }
  func.func @transform_4(%arg0: i32, %arg1: memref<6xi32, #tpu.memory_space<smem>>, %arg2: memref<6xi32, #tpu.memory_space<smem>>) -> (i32, i32, i32) {
    %c0_i32 = arith.constant 0 : i32
    %c0_i32_0 = arith.constant 0 : i32
    %c0_i32_1 = arith.constant 0 : i32
    %c0_i32_2 = arith.constant 0 : i32
    return %c0_i32, %c0_i32_0, %c0_i32_1 : i32, i32, i32
  }
  func.func @transform_5(%arg0: i32, %arg1: memref<6xi32, #tpu.memory_space<smem>>, %arg2: memref<6xi32, #tpu.memory_space<smem>>) -> (i32, i32, i32) {
    %c0_i32 = arith.constant 0 : i32
    %c0_i32_0 = arith.constant 0 : i32
    %c0_i32_1 = arith.constant 0 : i32
    return %arg0, %c0_i32, %c0_i32_0 : i32, i32, i32
  }
  func.func @transform_6(%arg0: i32, %arg1: memref<6xi32, #tpu.memory_space<smem>>, %arg2: memref<6xi32, #tpu.memory_space<smem>>) -> (i32, i32, i32) {
    %c0_i32 = arith.constant 0 : i32
    %c0_i32_0 = arith.constant 0 : i32
    %c0_i32_1 = arith.constant 0 : i32
    return %arg0, %c0_i32, %c0_i32_0 : i32, i32, i32
  }
  func.func @transform_7(%arg0: i32, %arg1: memref<6xi32, #tpu.memory_space<smem>>, %arg2: memref<6xi32, #tpu.memory_space<smem>>) -> (i32, i32, i32) {
    %c0_i32 = arith.constant 0 : i32
    %c0_i32_0 = arith.constant 0 : i32
    %c0_i32_1 = arith.constant 0 : i32
    return %arg0, %c0_i32, %c0_i32_0 : i32, i32, i32
  }
  func.func @transform_8(%arg0: i32, %arg1: memref<6xi32, #tpu.memory_space<smem>>, %arg2: memref<6xi32, #tpu.memory_space<smem>>) -> (i32, i32, i32) {
    %c0_i32 = arith.constant 0 : i32
    %c0_i32_0 = arith.constant 0 : i32
    %c0_i32_1 = arith.constant 0 : i32
    return %arg0, %c0_i32, %c0_i32_0 : i32, i32, i32
  }
  func.func @transform_9(%arg0: i32, %arg1: memref<6xi32, #tpu.memory_space<smem>>, %arg2: memref<6xi32, #tpu.memory_space<smem>>) -> (i32, i32, i32) {
    %c0_i32 = arith.constant 0 : i32
    %c0_i32_0 = arith.constant 0 : i32
    %c0_i32_1 = arith.constant 0 : i32
    return %arg0, %c0_i32, %c0_i32_0 : i32, i32, i32
  }
  func.func @transform_10(%arg0: i32, %arg1: memref<6xi32, #tpu.memory_space<smem>>, %arg2: memref<6xi32, #tpu.memory_space<smem>>) -> (i32, i32, i32) {
    %c0_i32 = arith.constant 0 : i32
    %c0_i32_0 = arith.constant 0 : i32
    %c0_i32_1 = arith.constant 0 : i32
    return %arg0, %c0_i32, %c0_i32_0 : i32, i32, i32
  }
  func.func @transform_11(%arg0: i32, %arg1: memref<6xi32, #tpu.memory_space<smem>>, %arg2: memref<6xi32, #tpu.memory_space<smem>>) -> (i32, i32) {
    %c0_i32 = arith.constant 0 : i32
    %c0_i32_0 = arith.constant 0 : i32
    %c0_i32_1 = arith.constant 0 : i32
    return %c0_i32, %c0_i32_0 : i32, i32
  }
  func.func @transform_12(%arg0: i32, %arg1: memref<6xi32, #tpu.memory_space<smem>>, %arg2: memref<6xi32, #tpu.memory_space<smem>>) -> (i32, i32) {
    %c0_i32 = arith.constant 0 : i32
    %c0_i32_0 = arith.constant 0 : i32
    %c0_i32_1 = arith.constant 0 : i32
    return %c0_i32, %c0_i32_0 : i32, i32
  }
  func.func @transform_13(%arg0: i32, %arg1: memref<6xi32, #tpu.memory_space<smem>>, %arg2: memref<6xi32, #tpu.memory_space<smem>>) -> (i32, i32) {
    %c0_i32 = arith.constant 0 : i32
    %c0_i32_0 = arith.constant 0 : i32
    %c0_i32_1 = arith.constant 0 : i32
    return %c0_i32, %c0_i32_0 : i32, i32
  }
}

</mosaic_0001>

<bundles_post_ra>
// kernel: tile.29
= control target key start
LH: loop header
LB: loop body
LE: loop exit
PB: predicated region body
PF: predicated region fallthrough
CT: control target
= control target key end

     0   :  { %vm42_vm0 = vcmask 1047556   ;;  %vm44_vm1 = vcmask 130048   ;;  %s93_s22 = smov 16   ;;  %s94_s25 = smov 32   ;;  %vm54_vm2 = vcmask 523648   ;;  %vm64_vm3 = vcmask 392448   ;;  %s146_s0 = inlined_call_operand.vmem [shape: f32[8,4,16], index: 0, kind: input, shape index: {}]   ;;  %s147_s1 = inlined_call_operand.vmem [shape: f32[8,64], index: 1, kind: output, shape index: {}]  }
   0x1   :  { %v82_v0 = vld [vmem:[%s146_s0 + $0x1c] sm:$0xf]  ;;  %v83_v1 = vld [vmem:[%s146_s0 + $0x18] sm:$0xf]  ;;  %v84_v2 = vld [vmem:[%s146_s0 + $0x14] sm:$0xf] }
   0x2   :  { %8 = vst [vmem:[#allocation0 + $0x38] sm:$0xf] %v82_v0  ;;  %13 = vst [vmem:[#allocation0 + $0x30] sm:$0xf] %v83_v1  ;;  %v85_v3 = vld [vmem:[%s146_s0 + $0x10] sm:$0xf] }
   0x3   :  { %18 = vst [vmem:[#allocation0 + $0x28] sm:$0xf] %v84_v2  ;;  %v86_v4 = vld [vmem:[%s146_s0 + $0xc] sm:$0xf]  ;;  %v87_v5 = vld [vmem:[%s146_s0 + $0x8] sm:$0xf] }
   0x4   :  { %23 = vst [vmem:[#allocation0 + $0x20] sm:$0xf] %v85_v3  ;;  %28 = vst [vmem:[#allocation0 + $0x18] sm:$0xf] %v86_v4  ;;  %v88_v6 = vld [vmem:[%s146_s0 + $0x4] sm:$0xf] }
   0x5   :  { %33 = vst [vmem:[#allocation0 + $0x10] sm:$0xf] %v87_v5  ;;  %v38_v7 = vld [vmem:[%s146_s0] sm:$0xf]  ;;  %37 = vst [vmem:[#allocation0 + $0x8] sm:$0xf] %v88_v6 }
   0x6   :  { %39 = vst [vmem:[#allocation0] sm:$0xf] %v38_v7  ;;  %s92_s0 = smov 48   ;;  %vm74_vm4 = vcmask 261248  }
   0xb   :  { %v49_v8 = vld [vmem:[#allocation0 + $0x3] ss:$8 sm:$0xf0]   ;;  %v59_v9 = vld [vmem:[#allocation0 + $0x2] ss:$8 sm:$0xf0]  }
   0xc   :  { %v69_v14 = vld [vmem:[#allocation0 + $0x1] ss:$8 sm:$0xf0]   ;;  %v41_v17 = vld [vmem:[#allocation0] ss:$8 sm:$0xf0]  }
   0xd   :  { %v47_v10 = vld [vmem:[#allocation0 + $0x3] ss:$8 sm:$0xf]   ;;  %v57_v11 = vld [vmem:[#allocation0 + $0x2] ss:$8 sm:$0xf]  }
   0xe   :  { %v51_v12 = vsel %vm42_vm0, %v49_v8, %v47_v10  ;;  %v67_v13 = vld [vmem:[#allocation0 + $0x1] ss:$8 sm:$0xf]   ;;  %v40_v16 = vld [vmem:[#allocation0] ss:$8 sm:$0xf]   ;;  %v61_v18 = vsel %vm42_vm0, %v59_v9, %v57_v11 }
   0xf   :  { %52 = vrot.lane.b32.xlu0 %v51_v12, %s92_s0  ;;  %v71_v15 = vsel %vm42_vm0, %v69_v14, %v67_v13  ;;  %v43_v19 = vsel %vm42_vm0, %v41_v17, %v40_v16 }
  0x10   :  { %72 = vrot.lane.b32.xlu1 %v71_v15, %s93_s22  ;;  %45 = vst.msk [vmem:[%s147_s1] sm:$0xff] %vm44_vm1, %v43_v19  }
  0x13   :  { %62 = vrot.lane.b32.xlu0 %v61_v18, %s94_s25 }
  0x81   :  { %v53_v20 = vpop.permute.xlu0 %52  }
  0x82   :  { %55 = vst.msk [vmem:[%s147_s1] sm:$0xff] %vm54_vm2, %v53_v20   ;;  %v73_v21 = vpop.permute.xlu1 %72  }
  0x85   :  { %v63_v22 = vpop.permute.xlu0 %62  }
  0x86   :  { %65 = vst.msk [vmem:[%s147_s1] sm:$0xff] %vm64_vm3, %v63_v22  }
  0x87   :  { %75 = vst.msk [vmem:[%s147_s1] sm:$0xff] %vm74_vm4, %v73_v21  }

// kernel: neg.1
= control target key start
LH: loop header
LB: loop body
LE: loop exit
PB: predicated region body
PF: predicated region fallthrough
CT: control target
= control target key end

     0   :  { %s24_s0 = inlined_call_operand.vmem [shape: f32[8,64], index: 0, kind: input, shape index: {}]   ;;  %s25_s1 = inlined_call_operand.vmem [shape: f32[8,64], index: 1, kind: output, shape index: {}]  }
   0x1   :  { %v2_v0 = vld [vmem:[%s24_s0] sm:$0xff] }
   0x2   :  { %v5_v1 = vxor.u32 2147483648, %v2_v0 }
   0x4   :  { %7 = vst [vmem:[%s25_s1] sm:$0xff] %v5_v1 }

// kernel: cqil_forward.1
= control target key start
LH: loop header
LB: loop body
LE: loop exit
PB: predicated region body
PF: predicated region fallthrough
CT: control target
= control target key end

     0   :  { %s3720_s0 = inlined_call_operand.vmem [shape: s32[6], index: 0, kind: input, shape index: {}]   ;;  %s3721_s2 = inlined_call_operand.vmem [shape: f32[16,128], index: 2, kind: input, shape index: {}]   ;;  %s3722_s3 = inlined_call_operand.vmem [shape: f32[16,128], index: 3, kind: input, shape index: {}]   ;;  %s3723_s4 = inlined_call_operand.vmem [shape: f32[16,128], index: 4, kind: input, shape index: {}]   ;;  %s3724_s5 = inlined_call_operand.vmem [shape: f32[16,16], index: 5, kind: input, shape index: {}]   ;;  %s3725_s6 = inlined_call_operand.vmem [shape: f32[4,1,128], index: 6, kind: input, shape index: {}]   ;;  %s3726_s7 = inlined_call_operand.vmem [shape: f32[6,1,128], index: 7, kind: input, shape index: {}]   ;;  %s3727_s8 = inlined_call_operand.hbm [shape: bf16[6,128,384], index: 8, kind: input, shape index: {}]   ;;  %s3728_s9 = inlined_call_operand.vmem [shape: bf16[6,128,128], index: 9, kind: input, shape index: {}]   ;;  %s3729_s10 = inlined_call_operand.vmem [shape: f32[6,1,128], index: 10, kind: input, shape index: {}]   ;;  %s3730_s11 = inlined_call_operand.hbm [shape: bf16[6,128,512], index: 11, kind: input, shape index: {}]   ;;  %s3731_s12 = inlined_call_operand.hbm [shape: bf16[6,256,128], index: 12, kind: input, shape index: {}]   ;;  %s3732_s13 = inlined_call_operand.vmem [shape: f32[1,128], index: 13, kind: input, shape index: {}]   ;;  %s3733_s14 = inlined_call_operand.vmem [shape: bf16[128,256], index: 14, kind: input, shape index: {}]   ;;  %s3734_s15 = inlined_call_operand.hbm [shape: f32[16,256], index: 15, kind: output, shape index: {}]   ;;  %s3735_s1 = inlined_call_operand.vmem [shape: s32[6], index: 1, kind: input, shape index: {}]  }
   0x1   :  { %3742 = sst [smem:[#allocation21_spill]] %s3727_s8  ;;  %s20_s20 = sshll.u32 %s3720_s0, 4  ;;  %s21_s20 = int_to_ptr.vmem [resolvable:$true] %s20_s20 }
   0x2   :  { %3743 = sst [smem:[#allocation22_spill]] %s3730_s11  ;;  %s24_s23 = sshll.u32 %s3735_s1, 4  ;;  %s25_s23 = int_to_ptr.vmem [resolvable:$true] %s24_s23 }
   0x3   :  { %3744 = sst [smem:[#allocation23_spill]] %s3732_s13  ;;  %s2897_s24 = scalar_lea.vmem %s21_s20, 16 }
   0x4   :  { %3745 = sst [smem:[#allocation24_spill]] %s3733_s14  ;;  %p2898_p0 = scmp.ne.s32.totalorder %s21_s20, %s2897_s24 }
   0x5   :  { %3746 = sst [smem:[#allocation25_spill]] %s3734_s15  ;;  %p2902_p1 = scmp.lt.s32.totalorder %s21_s20, %s21_s20 }
   0x6   :  { %p2903_p2 = scmp.lt.s32.totalorder %s2897_s24, %s2897_s24 }
   0x8   :  { %p2904_p3 = por %p2903_p2, %p2902_p1 }
   0xa   :  { %p2905_p4 = pnand %p2904_p3, %p2898_p0 }
   0xc   :  { %2908 = shalt.err (!%p2905_p4)  }
   0xd   :  { %s3083_s25 = smov [#allocation5]   ;;  %s2909_s26 = scalar_lea.vmem %s25_s23, 16 }
   0xe   :  { %23 = dma.vmem_to_smem %s21_s20, 16, %s3083_s25, [#allocation4] }
   0xf   :  { %p2910_p5 = scmp.ne.s32.totalorder %s25_s23, %s2909_s26  ;;  %p2914_p6 = scmp.lt.s32.totalorder %s25_s23, %s25_s23 }
  0x10   :  { %p2915_p7 = scmp.lt.s32.totalorder %s2909_s26, %s2909_s26 }
  0x12   :  { %p2916_p8 = por %p2915_p7, %p2914_p6 }
  0x14   :  { %p2917_p9 = pnand %p2916_p8, %p2910_p5 }
  0x16   :  { %2920 = shalt.err (!%p2917_p9)  }
  0x17   :  { %s3084_s0 = smov [#allocation6]  }
  0x18   :  { %27 = dma.vmem_to_smem %s25_s23, 16, %s3084_s0, [#allocation4] }
  0x19   :  { %3053 = dma.done.wait [#allocation4], 32 }
  0x1a   :  { %3054 = vsyncadd [#allocation4], 4294967264 }
  0x1b   :  { %29 = sfence }
  0x1c   :  { %30 = vsyncpa [#allocation8], 0 }
  0x1d   :  { %32 = vsyncpa [#allocation8 + $0x1], 0 }
  0x1e   :  { %33 = vsyncpa [#allocation11], 0 }
  0x1f   :  { %35 = vsyncpa [#allocation11 + $0x1], 0 }
  0x20   :  { %36 = vsyncpa [#allocation9], 0  ;;  %s3189_s1 = smov 0   ;;  %s3191_s27 = smov 0  }
  0x21   :  { %s3193_s28 = smov 0   ;;  %s3195_s29 = smov 0  }
  0x22 LB: > { %3747 = sst [smem:[#allocation18_spill]] %s3077_s28  ;;  %s3208_s30 = sadd.s32 4294967295, %s3081_s29   ;;  %s3081_s29 = sphi %s3195_s29, %s3761_s29   ;;  %s3077_s28 = sphi %s3193_s28, %s3763_s28   ;;  %s3073_s27 = sphi %s3191_s27, %s3765_s27   ;;  %s3069_s1 = sphi %s3189_s1, %s3764_s1  }
  0x23   : > { %s3211_s16 = sadd.s32 1, %s3081_s29   ;;  %s180_s18 = sadd.s32 1, %s3077_s28 }
  0x24   : > { %3748 = sst [smem:[#allocation19_spill]] %s3211_s16  ;;  %s177_s17 = ssub.s32 %s3081_s29, %s3211_s16 }
  0x25   : > { %p178_p10 = scmp.eq.s32.totalorder %s177_s17, 0  ;;  %p187_p11 = scmp.ne.s32.totalorder %s3077_s28, %s3073_s27 }
  0x26   : > { %p188_p12 = scmp.eq.s32.totalorder %s3081_s29, 0  ;;  %p193_p13 = scmp.ne.s32.totalorder %s3073_s27, %s3069_s1 }
  0x27   : > { %s3221_s19 = scalar_select %p178_p10, %s3077_s28, %s180_s18  }
  0x28   : > { %p189_p0 = por %p188_p12, %p187_p11  ;;  %p194_p1 = scmp.eq.s32.totalorder %s3208_s30, 0 }
  0x29   : > { %3749 = sst [smem:[#allocation20_spill]] %s3221_s19  ;;  %p2655_p2 = scmp.lt.s32.totalorder %s3081_s29, 6 }
  0x2a   : > { %p3225_p3 = por %p194_p1, %p193_p13  ;;  %s3230_s21 = sand.u32 1, %s3077_s28  }
  0x2b   : > { %p3232_p4 = pnand %p2655_p2, %p189_p0  ;;  %s446_s23 = sand.u32 1, %s3081_s29  }
  0x2c   : > { %s3750_s20 = scalar_select %p3225_p3, 1, 0 }
  0x2d   : > { %s2352_s24 = sshll.u32 %s3230_s21, 8  ;;  %s2485_s25 = sshll.u32 %s3081_s29, 12 }
  0x2e   : > { %s450_s26 = scalar_lea.vmem [#allocation10], %s2352_s24  ;;  %s3752_s11 = sld [smem:[#allocation22_spill]] }
  0x2f   : > { %s457_s0 = sshll.u32 %s450_s26, 4  ;;  %s3246_s19 = scalar_lea.sflag [#allocation11], %s446_s23  ;;  %s3244_s0 = int_to_ptr.vmem [resolvable:$true] %s457_s0 }
  0x30   : > { %p3252_p6 = pneg %p3232_p4 }
  0x34   : > { %s3242_s18 = scalar_lea.hbm %s3752_s11, %s2485_s25  ;;  %s2926_s26 = scalar_lea.hbm %s3752_s11, 24576 }
  0x35   : > { %s2921_s28 = scalar_lea.hbm %s3242_s18, 4096  ;;  %p2927_p9 = scmp.lt.u32.totalorder %s3242_s18, %s3752_s11 }
  0x36   : > { %p2922_p5 = scmp.ne.s32.totalorder %s3242_s18, %s2921_s28  ;;  %p2928_p10 = scmp.lt.u32.totalorder %s2926_s26, %s2921_s28 }
  0x37   : > { %p2930_p12 = scmp.lt.u32.totalorder %s2921_s28, %s3242_s18 }
  0x38   : > { %p2924_p7 = pnand %p3252_p6, %p2922_p5  ;;  %p2929_p11 = por %p2928_p10, %p2927_p9 }
  0x3a   : > { %p2925_p8 = pneg %p2924_p7  ;;  %p2931_p13 = por %p2930_p12, %p2929_p11 }
  0x3c   : > { %p2932_p0 = pnand %p2931_p13, %p2925_p8 }
  0x3e   : > { %2935 = shalt.err (!%p2932_p0)
}
  0x3f   : > { %s2936_s23 = scalar_lea.vmem %s3244_s0, 4096  ;;  %s3085_s24 = smov [#allocation10]  }
  0x40   : > { %p2937_p1 = scmp.ne.s32.totalorder %s3244_s0, %s2936_s23  ;;  %s2941_s25 = sshll.u32 %s3085_s24, 4  ;;  %s2942_s25 = int_to_ptr.vmem [resolvable:$false] %s2941_s25 }
  0x41   : > { %s2943_s1 = scalar_lea.vmem %s2942_s25, 8192  ;;  %p2944_p7 = scmp.lt.s32.totalorder %s3244_s0, %s2942_s25 }
  0x42   : > { %p2939_p2 = pnand %p2937_p1, %p3252_p6  ;;  %p2945_p3 = scmp.lt.s32.totalorder %s2943_s1, %s2936_s23 }
  0x44   : > { %p2940_p5 = pneg %p2939_p2  ;;  %p2946_p9 = por %p2945_p3, %p2944_p7 }
  0x46   : > { %p2947_p10 = pnand %p2946_p9, %p2940_p5 }
  0x48   : > { %2950 = shalt.err (!%p2947_p10)
}
  0x49   : > { %s3086_s28 = smov 256   ;;  %s3087_s26 = smov 16  }
  0x4a   : > { %2651 = dma.hbm_to_vmem [thread:$0]  (!%p3232_p4), %s3242_s18, 4096, %s3244_s0, %s3246_s19, %s3086_s28, %s3086_s28, %s3087_s26  }
  0x4b   : > { %p2358_p8 = scmp.ge.s32.totalorder %s3081_s29, 1  ;;  %p486_p11 = scmp.lt.s32.totalorder %s3081_s29, 7 }
  0x4c   : > { %s2632_s17 = smul.u32 192, %s3230_s21  ;;  %s3755_s8 = sld [smem:[#allocation21_spill]] }
  0x4d   : > { %p3279_p3 = pnand %p2358_p8, %p486_p11  ;;  %s2633_s24 = smul.u32 3072, %s3081_s29 }
  0x4e   : > { %s415_s15 = scalar_lea.vmem [#allocation7], %s2632_s17  ;;  %s412_s0 = scalar_lea.sflag [#allocation8], %s3230_s21 }
  0x4f   : > { %s3754_s23 = scalar_select %p3279_p3, 1, 0 }
  0x50   : > { %s422_s13 = sshll.u32 %s415_s15, 4  ;;  %s3289_s13 = int_to_ptr.vmem [resolvable:$true] %s422_s13 }
  0x52   : > { %s3287_s11 = scalar_lea.hbm %s3755_s8, %s2633_s24  ;;  %s2956_s25 = scalar_lea.hbm %s3755_s8, 18432 }
  0x53   : > { %s2951_s18 = scalar_lea.hbm %s3287_s11, 3072  ;;  %p2957_p1 = scmp.lt.u32.totalorder %s3287_s11, %s3755_s8 }
  0x54   : > { %p2952_p12 = scmp.ne.s32.totalorder %s3287_s11, %s2951_s18  ;;  %p2958_p2 = scmp.lt.u32.totalorder %s2956_s25, %s2951_s18 }
  0x55   : > { %p2960_p7 = scmp.lt.u32.totalorder %s2951_s18, %s3287_s11 }
  0x56   : > { %p2954_p13 = pnand %p2952_p12, %p3252_p6  ;;  %p2959_p5 = por %p2958_p2, %p2957_p1 }
  0x58   : > { %p2955_p0 = pneg %p2954_p13  ;;  %p2961_p9 = por %p2960_p7, %p2959_p5 }
  0x5a   : > { %p2962_p10 = pnand %p2961_p9, %p2955_p0 }
  0x5c   : > { %2965 = shalt.err (!%p2962_p10)
}
  0x5d   : > { %s2966_s15 = scalar_lea.vmem %s3289_s13, 3072  ;;  %s3088_s17 = smov [#allocation7]  }
  0x5e   : > { %p2967_p8 = scmp.ne.s32.totalorder %s3289_s13, %s2966_s15  ;;  %s2971_s28 = sshll.u32 %s3088_s17, 4  ;;  %s2972_s28 = int_to_ptr.vmem [resolvable:$false] %s2971_s28 }
  0x5f   : > { %s2973_s26 = scalar_lea.vmem %s2972_s28, 6144  ;;  %p2974_p13 = scmp.lt.s32.totalorder %s3289_s13, %s2972_s28 }
  0x60   : > { %p2969_p11 = pnand %p2967_p8, %p3252_p6  ;;  %p2975_p3 = scmp.lt.s32.totalorder %s2973_s26, %s2966_s15 }
  0x62   : > { %p2970_p12 = pneg %p2969_p11  ;;  %p2976_p1 = por %p2975_p3, %p2974_p13 }
  0x64   : > { %p2977_p2 = pnand %p2976_p1, %p2970_p12 }
  0x66   : > { %2980 = shalt.err (!%p2977_p2)
}
  0x67   : > { %s3089_s18 = smov 192   ;;  %s3090_s25 = smov 12  }
  0x68   : > { %2648 = dma.hbm_to_vmem [thread:$0]  (!%p3232_p4), %s3287_s11, 3072, %s3289_s13, %s412_s0, %s3089_s18, %s3089_s18, %s3090_s25  }
  0x69   : > { %s2355_s24 = sshll.u32 %s3230_s21, 7  ;;  %s2486_s1 = sshll.u32 %s3081_s29, 11 }
  0x6a   : > { %s3320_s15 = scalar_lea.hbm %s3731_s12, %s2486_s1  ;;  %s471_s26 = scalar_lea.vmem [#allocation12], %s2355_s24 }
  0x6b   : > { %s478_s8 = sshll.u32 %s471_s26, 4  ;;  %s2981_s14 = scalar_lea.hbm %s3320_s15, 2048  ;;  %s3322_s8 = int_to_ptr.vmem [resolvable:$true] %s478_s8 }
  0x6c   : > { %p2982_p3 = scmp.ne.s32.totalorder %s3320_s15, %s2981_s14  ;;  %s2986_s29 = scalar_lea.hbm %s3731_s12, 12288 }
  0x6d   : > { %p2987_p7 = scmp.lt.u32.totalorder %s3320_s15, %s3731_s12  ;;  %p2988_p9 = scmp.lt.u32.totalorder %s2986_s29, %s2981_s14 }
  0x6e   : > { %p2984_p0 = pnand %p2982_p3, %p3252_p6  ;;  %p2990_p8 = scmp.lt.u32.totalorder %s2981_s14, %s3320_s15 }
  0x6f   : > { %p2989_p10 = por %p2988_p9, %p2987_p7 }
  0x70   : > { %p2985_p5 = pneg %p2984_p0 }
  0x71   : > { %p2991_p11 = por %p2990_p8, %p2989_p10 }
  0x73   : > { %p2992_p12 = pnand %p2991_p11, %p2985_p5 }
  0x75   : > { %2995 = shalt.err (!%p2992_p12)
}
  0x76   : > { %s2996_s18 = scalar_lea.vmem %s3322_s8, 2048  ;;  %s3091_s25 = smov [#allocation12]  }
  0x77   : > { %p2997_p13 = scmp.ne.s32.totalorder %s3322_s8, %s2996_s18  ;;  %s3001_s24 = sshll.u32 %s3091_s25, 4  ;;  %s3002_s24 = int_to_ptr.vmem [resolvable:$false] %s3001_s24 }
  0x78   : > { %s3003_s1 = scalar_lea.vmem %s3002_s24, 4096  ;;  %p3004_p3 = scmp.lt.s32.totalorder %s3322_s8, %s3002_s24 }
  0x79   : > { %p2999_p1 = pnand %p2997_p13, %p3252_p6  ;;  %p3005_p0 = scmp.lt.s32.totalorder %s3003_s1, %s2996_s18 }
  0x7b   : > { %p3000_p2 = pneg %p2999_p1  ;;  %p3006_p7 = por %p3005_p0, %p3004_p3 }
  0x7d   : > { %p3007_p9 = pnand %p3006_p7, %p3000_p2 }
  0x7f   : > { %3010 = shalt.err (!%p3007_p9)
}
  0x80   : > { %s3092_s14 = smov 64   ;;  %s3093_s17 = smov 4  }
  0x81   : > { %2654 = dma.hbm_to_vmem [thread:$0]  (!%p3232_p4), %s3320_s15, 2048, %s3322_s8, %s3246_s19, %s3092_s14, %s3092_s14, %s3093_s17  }
  0x82   : > { %p3756_p6 = scmp.ne.s32.totalorder %s3754_s23, 0 }
  0x83   : > { %s492_s16 = sand.u32 (!%p3756_p6), 1, %s3073_s27   ;;  %p3757_p5 = scmp.ne.s32.totalorder (!%p3756_p6), %s3750_s20, 0 }
  0x84   : > { %490 = sbr.rel (%p3756_p6) target bundleno = 2748 (0xabc), region = 72  ;;  %s493_s26 = scalar_lea.sflag (!%p3756_p6), [#allocation8], %s492_s16 }
  0x85   : > { %s2634_s28 = smul.u32 (!%p3756_p6), 192, %s492_s16 }
  0x87   : > { %s3349_s11 = scalar_lea.vmem (!%p3756_p6), [#allocation7], %s2634_s28 }
  0x8b   : > { %3056 = dma.done.wait (%p3757_p5), %s493_s26, 3072  }
  0x8c   : > { %3058 = vsyncadd (%p3757_p5), %s493_s26, 4294964224  ;;  %s501_s13 = sand.u32 1, %s3208_s30   ;;  %s2359_s22 = sshll.u32 %s492_s16, 8 }
  0x8d   : > { %s502_s8 = scalar_lea.sflag [#allocation11], %s501_s13  ;;  %s3356_s19 = scalar_lea.vmem [#allocation10], %s2359_s22 }
  0x8e   : > { %3060 = dma.done.wait (%p3757_p5), %s502_s8, 6144  }
  0x8f   : > { %3062 = vsyncadd (%p3757_p5), %s502_s8, 4294961152  ;;  %s2360_s23 = sshll.u32 %s492_s16, 7  ;;  %p573_p4 = scmp.lt.s32.totalorder %s3208_s30, 5 }
  0x90   : > { %s3380_s16 = scalar_lea.vmem [#allocation12], %s2360_s23  ;;  %p2363_p10 = scmp.ne.s32.totalorder %s3208_s30, 0 }
  0x91   : > { %s3364_s15 = scalar_select %p573_p4, %s3208_s30, 5 }
  0x92   : > { %588 = sbr.rel (%p2363_p10) target bundleno = 153 (0x99), region = 88  ;;  %v589_v0 = vld [vmem:[%s3721_s2] sm:$0xff] (!%p2363_p10)  ;;  %v590_v1 = vld [vmem:[%s3721_s2 + $0x8] sm:$0xff] (!%p2363_p10) }
  0x93   : > { %s575_s0 = scalar_lea.vmem %s3726_s7, %s3364_s15  ;;  %s2487_s18 = sshll.u32 %s3364_s15, 6  ;;  %591 = vst [vmem:[#allocation2] sm:$0xff] (!%p2363_p10), %v589_v0  ;;  %592 = vst [vmem:[#allocation2 + $0x8] sm:$0xff] (!%p2363_p10), %v590_v1 }
  0x94   : > { %s3374_s1 = scalar_lea.vmem %s3728_s9, %s2487_s18  ;;  %s583_s17 = scalar_lea.vmem %s3729_s10, %s3364_s15 }
  0x99 PF: > { %s593_s8 = sld [smem:[#allocation5 + %s3208_s30]] }
  0x9f   : > { %p2364_p8 = scmp.ne.s32.totalorder %s593_s8, 1 }
  0xa0   : > { %v3094_v2 = vmov (!%p2364_p8), 0.0  }
  0xa1   : > { %597 = sbr.rel (%p2364_p8) target bundleno = 168 (0xa8), region = 92  ;;  %598 = vst [vmem:[#allocation3] sm:$0xff] (!%p2364_p8), %v3094_v2  ;;  %599 = vst [vmem:[#allocation3 + $0x8] sm:$0xff] (!%p2364_p8), %v3094_v2 }
  0xa8 PF: > { %v3390_v3 = vld [vmem:[#allocation2] sm:$0xff]  ;;  %v3392_v4 = vld [vmem:[#allocation2 + $0x8] sm:$0xff]  ;;  %v3095_v7 = vmov 0.0   ;;  %v2717_v15 = vld [vmem:[%s3349_s11 + $0x30] ss:$12 sps:$4 sm:$0xff]   ;;  %v3096_v29 = vmov 0  }
  0xa9   : > { %v609_v5 = vmul.f32 %v3390_v3, %v3390_v3  ;;  %v2707_v6 = vld [vmem:[%s3349_s11 + $0x4] ss:$12 sps:$4 sm:$0xff]   ;;  %2544 = vmatprep.subr.bf16.mxu1 %v3095_v7  ;;  %v2709_v8 = vld [vmem:[%s3349_s11] ss:$12 sps:$4 sm:$0xff]   ;;  %v2710_v9 = vld [vmem:[%s3349_s11 + $0x8] ss:$12 sps:$4 sm:$0xff]   ;;  %v610_v10 = vmul.f32 %v3392_v4, %v3392_v4  ;;  %825 = vmatprep.mubr.bf16.mxu0 %v3096_v29 }
  0xaa   : > { %793 = vmatprep.subr.bf16.mxu0 %v2707_v6  ;;  %v2711_v11 = vld [vmem:[%s3349_s11 + $0x1c] ss:$12 sps:$4 sm:$0xff]   ;;  %2545 = vmatpush3.bf16.msra.mxu1 %v2710_v9  ;;  %v2713_v12 = vld [vmem:[%s3349_s11 + $0x18] ss:$12 sps:$4 sm:$0xff]   ;;  %v2714_v13 = vld [vmem:[%s3349_s11 + $0x20] ss:$12 sps:$4 sm:$0xff]  }
  0xab   : > { %611 = vadd.xlane.f32.xlu0 %v609_v5  ;;  %794 = vmatpush1.bf16.msra.mxu0 %v2709_v8  ;;  %v2715_v14 = vld [vmem:[%s3349_s11 + $0x34] ss:$12 sps:$4 sm:$0xff]   ;;  %v2718_v16 = vld [vmem:[%s3349_s11 + $0x38] ss:$12 sps:$4 sm:$0xff]   ;;  %v2722_v19 = vld [vmem:[%s3349_s11 + $0x50] ss:$12 sps:$4 sm:$0xff]  }
  0xac   : > { %795 = vmatprep.subr.bf16.mxu0 %v2711_v11  ;;  %2546 = vmatprep.subr.bf16.mxu1 %v3095_v7  ;;  %v2719_v17 = vld [vmem:[%s3349_s11 + $0x4c] ss:$12 sps:$4 sm:$0xff]   ;;  %v2721_v18 = vld [vmem:[%s3349_s11 + $0x48] ss:$12 sps:$4 sm:$0xff]   ;;  %v2723_v20 = vld [vmem:[%s3349_s11 + $0x64] ss:$12 sps:$4 sm:$0xff]  }
  0xad   : > { %v2725_v21 = vld [vmem:[%s3349_s11 + $0x60] ss:$12 sps:$4 sm:$0xff]   ;;  %v2726_v22 = vld [vmem:[%s3349_s11 + $0x68] ss:$12 sps:$4 sm:$0xff]   ;;  %v2729_v24 = vld [vmem:[%s3349_s11 + $0x78] ss:$12 sps:$4 sm:$0xff]  }
  0xae   : > { %2547 = vmatpush3.bf16.msra.mxu1 %v2714_v13  ;;  %v2727_v23 = vld [vmem:[%s3349_s11 + $0x7c] ss:$12 sps:$4 sm:$0xff]   ;;  %v2730_v25 = vld [vmem:[%s3349_s11 + $0x80] ss:$12 sps:$4 sm:$0xff]   ;;  %v2734_v28 = vld [vmem:[%s3349_s11 + $0x98] ss:$12 sps:$4 sm:$0xff]  }
  0xaf   : > { %613 = vadd.xlane.f32.xlu0 %v610_v10  ;;  %796 = vmatpush1.bf16.msra.mxu0 %v2713_v12  ;;  %v2731_v26 = vld [vmem:[%s3349_s11 + $0x94] ss:$12 sps:$4 sm:$0xff]   ;;  %v2733_v27 = vld [vmem:[%s3349_s11 + $0x90] ss:$12 sps:$4 sm:$0xff]   ;;  %vm3097_vm0 = vmmov 0   ;;  %s3098_s29 = smov 64  }
  0xb0   : > { %2548 = vmatprep.subr.bf16.mxu1 %v3095_v7  ;;  %797 = vmatprep.subr.bf16.mxu0 %v2715_v14  ;;  %v2735_v30 = vld [vmem:[%s3349_s11 + $0xac] ss:$12 sps:$4 sm:$0xff]   ;;  %v2737_v31 = vld [vmem:[%s3349_s11 + $0xa8] ss:$12 sps:$4 sm:$0xff]   ;;  %v2738_v32 = vld [vmem:[%s3349_s11 + $0xb0] ss:$12 sps:$4 sm:$0xff]  }
  0xb1   : > { %2560 = vmatprep.mubr.msk.bf16.mxu1 %vm3097_vm0, %v3095_v7  ;;  %v2365_v42 = vld [vmem:[%s575_s0] ss:$0 sm:$0xff]  ;;  %v603_v60 = vld [vmem:[%s3722_s3 + $0x8] sm:$0xff]  ;;  %vm954_vm1 = vcmask 130048   ;;  %s2030_s15 = sld [smem:[#allocation6 + %s3208_s30]] }
  0xb2   : > { %2549 = vmatpush3.bf16.msra.mxu1 %v2718_v16  ;;  %v604_v56 = vld [vmem:[%s3723_s4] sm:$0xff]  ;;  %v605_v61 = vld [vmem:[%s3723_s4 + $0x8] sm:$0xff] }
  0xb3   : > { %798 = vmatpush1.bf16.msra.mxu0 %v2717_v15  ;;  %2550 = vmatprep.subr.bf16.mxu1 %v3095_v7  ;;  %v602_v59 = vld [vmem:[%s3722_s3] sm:$0xff] }
  0xb4   : > { %799 = vmatprep.subr.bf16.mxu0 %v2719_v17  ;;  %v3465_v12 = vld [vmem:[%s3725_s6] ss:$0 sm:$0xff]  ;;  %v3470_v16 = vld [vmem:[%s3725_s6 + $0x1] ss:$0 sm:$0xff]  ;;  %v3475_v17 = vld [vmem:[%s3725_s6 + $0x2] ss:$0 sm:$0xff] }
  0xb6   : > { %2551 = vmatpush3.bf16.msra.mxu1 %v2722_v19 }
  0xb7   : > { %800 = vmatpush1.bf16.msra.mxu0 %v2721_v18  ;;  %2552 = vmatprep.subr.bf16.mxu1 %v3095_v7  ;;  %v3480_v18 = vld [vmem:[%s3725_s6 + $0x3] ss:$0 sm:$0xff]  ;;  %p2462_p11 = scmp.ne.s32.totalorder %s2030_s15, 1 }
  0xb8   : > { %801 = vmatprep.subr.bf16.mxu0 %v2723_v20 }
  0xba   : > { %2553 = vmatpush3.bf16.msra.mxu1 %v2726_v22 }
  0xbb   : > { %802 = vmatpush1.bf16.msra.mxu0 %v2725_v21  ;;  %2554 = vmatprep.subr.bf16.mxu1 %v3095_v7 }
  0xbc   : > { %803 = vmatprep.subr.bf16.mxu0 %v2727_v23 }
  0xbe   : > { %2555 = vmatpush3.bf16.msra.mxu1 %v2730_v25 }
  0xbf   : > { %804 = vmatpush1.bf16.msra.mxu0 %v2729_v24  ;;  %2556 = vmatprep.subr.bf16.mxu1 %v3095_v7 }
  0xc0   : > { %805 = vmatprep.subr.bf16.mxu0 %v2731_v26 }
  0xc2   : > { %2557 = vmatpush3.bf16.msra.mxu1 %v2734_v28 }
  0xc3   : > { %806 = vmatpush1.bf16.msra.mxu0 %v2733_v27  ;;  %2558 = vmatprep.subr.bf16.mxu1 %v3095_v7 }
  0xc4   : > { %807 = vmatprep.subr.bf16.mxu0 %v2735_v30 }
  0xc6   : > { %2559 = vmatpush3.bf16.msra.mxu1 %v2738_v32 }
  0xc7   : > { %808 = vmatpush1.bf16.msra.mxu0 %v2737_v31  ;;  %2570 = vmatprep.subr.bf16.mxu1 %v3095_v7 }
  0xc8   : > { %2564 = vmatprep.subr.bf16.mxu0 %v3095_v7 }
 0x138   : > { %v612_v33 = vpop.xlane.xlu0 %611 }
 0x139   : > { %v616_v34 = vmul.f32 0.0078125, %v612_v33 }
 0x13b   : > { %v618_v35 = vadd.f32 1e-06, %v616_v34  ;;  %v606_v34 = vld [vmem:[%s3724_s5] sm:$0xff] }
 0x13c   : > { %v614_v36 = vpop.xlane.xlu0 %613 }
 0x13d   : > { %2811 = vrsqrt.f32 %v618_v35  ;;  %v617_v37 = vmul.f32 0.0078125, %v614_v36 }
 0x13f   : > { %v619_v38 = vadd.f32 1e-06, %v617_v37 }
 0x141   : > { %2813 = vrsqrt.f32 %v619_v38  ;;  %v607_v38 = vld [vmem:[%s3724_s5 + $0x8] sm:$0xff] }
 0x147   : > { %v2812_v39 = vpop.eup %2811 }
 0x148   : > { %v622_v40 = vmul.f32 %v2812_v39, %v3390_v3 }
 0x14a   : > { %v630_v44 = vmul.f32 %v2365_v42, %v622_v40 }
 0x14b   : > { %v2814_v41 = vpop.eup %2813 }
 0x14c   : > { %v623_v43 = vmul.f32 %v2814_v41, %v3392_v4 }
 0x14e   : > { %v631_v45 = vmul.f32 %v2365_v42, %v623_v43 }
 0x150   : > { %v632_v46 = vpack.c.bf16 %v631_v45, %v630_v44 }
 0x152   : > { %826 = vmatmul.mubr.bf16.vlgmr.msra.gmra.mrb[0].mxu0 %v632_v46  ;;  %2561 = vmatmul.mubr.bf16.vlgmr.msra.gmra.mrb[0].mxu1 %v632_v46 }
 0x153   : > { %2566 = vmatprep.mubr.msk.bf16.mxu0 %vm3097_vm0, %v3095_v7  ;;  %2572 = vmatprep.mubr.msk.bf16.mxu1 %vm3097_vm0, %v3095_v7 }
 0x225   : > { %v827_v47 = vpop.f32.mrb[0].mxu0  ;;  %v870_v48 = vpop.f32.mrb[0].mxu1 }
 0x226   : > { %v2562_v49 = vpop.f32.mrb[1].mxu1  ;;  %879 = vrot.lane.b32.xlu0 %v827_v47, %s3098_s29  ;;  %v829_v50 = vpop.f32.mrb[1].mxu0  ;;  %v877_v6 = vmul.f32 %v827_v47, %v602_v59 }
 0x227   : > { %v873_v51 = vpop.f32.mrb[2].mxu1  ;;  %889 = vrot.lane.b32.xlu1 %v829_v50, %s3098_s29  ;;  %v831_v52 = vpop.f32.mrb[2].mxu0  ;;  %v887_v1 = vmul.f32 %v829_v50, %v602_v59 }
 0x228   : > { %v3446_v53 = vpack.c.bf16 %v873_v51, %v870_v48  ;;  %v833_v54 = vpop.f32.mrb[3].mxu0  ;;  %v2563_v55 = vpop.f32.mrb[3].mxu1  ;;  %v878_v13 = vmul.f32 %v831_v52, %v603_v60 }
 0x229   : > { %v888_v2 = vmul.f32 %v833_v54, %v603_v60 }
 0x22a   : > { %2571 = vmatpush3.bf16.msra.mxu1 %v3446_v53 }
 0x22b   : > { %891 = vrot.lane.b32.xlu1 %v833_v54, %s3098_s29  ;;  %2582 = vmatprep.subr.bf16.mxu1 %v3095_v7 }
 0x22f   : > { %881 = vrot.lane.b32.xlu1 %v831_v52, %s3098_s29 }
 0x298   : > { %v880_v58 = vpop.permute.xlu0 %879 }
 0x299   : > { %v890_v57 = vpop.permute.xlu1 %889  ;;  %v883_v63 = vmul.f32 %v880_v58, %v604_v56 }
 0x29a   : > { %v893_v62 = vmul.f32 %v890_v57, %v604_v56 }
 0x29b   : > { %v885_v10 = vadd.f32 %v883_v63, %v877_v6 }
 0x29c   : > { %v895_v8 = vadd.f32 %v893_v62, %v887_v1 }
 0x29d   : > { %v892_v0 = vpop.permute.xlu1 %891  ;;  %v906_v20 = vmul.f32 %v3465_v12, %v885_v10  ;;  %v1034_v21 = vmul.f32 %v3470_v16, %v885_v10  ;;  %v1161_v22 = vmul.f32 %v3475_v17, %v885_v10  ;;  %v1288_v23 = vmul.f32 %v3480_v18, %v885_v10 }
 0x29e   : > { %v894_v5 = vmul.f32 %v892_v0, %v605_v61 }
 0x2a0   : > { %v896_v9 = vadd.f32 %v894_v5, %v888_v2 }
 0x2a1   : > { %v882_v11 = vpop.permute.xlu1 %881 }
 0x2a2   : > { %v897_v14 = vpack.c.bf16 %v896_v9, %v895_v8  ;;  %v884_v15 = vmul.f32 %v882_v11, %v605_v61 }
 0x2a4   : > { %v886_v19 = vadd.f32 %v884_v15, %v878_v13  ;;  %2565 = vmatpush3.bf16.xpose.msra.mxu0 %v897_v14 }
 0x2a5   : > { %2576 = vmatprep.subr.bf16.mxu0 %v3095_v7 }
 0x2a6   : > { %v907_v24 = vmul.f32 %v3465_v12, %v886_v19  ;;  %v1035_v25 = vmul.f32 %v3470_v16, %v886_v19  ;;  %v1162_v26 = vmul.f32 %v3475_v17, %v886_v19  ;;  %v1289_v27 = vmul.f32 %v3480_v18, %v886_v19 }
 0x2a8   : > { %v908_v28 = vpack.c.bf16 %v907_v24, %v906_v20  ;;  %v1036_v30 = vpack.c.bf16 %v1035_v25, %v1034_v21  ;;  %v1163_v31 = vpack.c.bf16 %v1162_v26, %v1161_v22  ;;  %v1290_v32 = vpack.c.bf16 %v1289_v27, %v1288_v23 }
 0x2ab   : > { %2567 = vmatmul.mubr.bf16.vlgmr.msra.gmra.mrb[4].mxu0 %v908_v28 }
 0x2ac   : > { %2577 = vmatpush3.bf16.xpose.msra.mxu0 %v897_v14  ;;  %2578 = vmatprep.mubr.msk.bf16.mxu0 %vm3097_vm0, %v3095_v7 }
 0x2ad   : > { %2588 = vmatprep.subr.bf16.mxu0 %v3095_v7 }
 0x2b3   : > { %2579 = vmatmul.mubr.bf16.vlgmr.msra.gmra.mrb[8].mxu0 %v1036_v30 }
 0x2b4   : > { %2589 = vmatpush3.bf16.xpose.msra.mxu0 %v897_v14  ;;  %2590 = vmatprep.mubr.msk.bf16.mxu0 %vm3097_vm0, %v3095_v7 }
 0x2b5   : > { %2600 = vmatprep.subr.bf16.mxu0 %v3095_v7 }
 0x2bb   : > { %2591 = vmatmul.mubr.bf16.vlgmr.msra.gmra.mrb[12].mxu0 %v1163_v31 }
 0x2bc   : > { %2601 = vmatpush3.bf16.xpose.msra.mxu0 %v897_v14  ;;  %2602 = vmatprep.mubr.msk.bf16.mxu0 %vm3097_vm0, %v3095_v7 }
 0x2bd   : > { %2612 = vmatprep.subr.bf16.mxu0 %v3095_v7 }
 0x2c3   : > { %2603 = vmatmul.mubr.bf16.vlgmr.msra.gmra.mrb[16].mxu0 %v1290_v32 }
 0x2c4   : > { %2628 = vmatprep.mubr.msk.bf16.mxu0 %vm3097_vm0, %v3095_v7 }
 0x37e   : > { %v943_v33 = vpop.f32.mrb[4].mxu0 }
 0x37f   : > { %v950_v35 = vmul.f32 0.17677669, %v943_v33  ;;  %v2568_v36 = vpop.f32.mrb[5].mxu0 }
 0x380   : > { %v946_v37 = vpop.f32.mrb[6].mxu0 }
 0x381   : > { %v951_v39 = vmul.f32 0.17677669, %v946_v37  ;;  %v2569_v40 = vpop.f32.mrb[7].mxu0  ;;  %v952_v41 = vadd.f32 %v950_v35, %v606_v34 }
 0x383   : > { %v955_v42 = vsel %vm954_vm1, %v952_v41, -inf  ;;  %v953_v43 = vadd.f32 %v951_v39, %v607_v38 }
 0x384   : > { %956 = vmax.xlane.f32.xlu1 %v955_v42 }
 0x385   : > { %v958_v44 = vsel %vm954_vm1, %v953_v43, -inf }
 0x386   : > { %959 = vmax.xlane.f32.xlu0 %v958_v44  ;;  %v1071_v45 = vpop.f32.mrb[8].mxu0 }
 0x387   : > { %v1078_v46 = vmul.f32 0.17677669, %v1071_v45  ;;  %v2580_v47 = vpop.f32.mrb[9].mxu0 }
 0x388   : > { %v1074_v48 = vpop.f32.mrb[10].mxu0 }
 0x389   : > { %v1079_v49 = vmul.f32 0.17677669, %v1074_v48  ;;  %v2581_v50 = vpop.f32.mrb[11].mxu0  ;;  %v1080_v51 = vadd.f32 %v1078_v46, %v606_v34 }
 0x38b   : > { %v1082_v52 = vsel %vm954_vm1, %v1080_v51, -inf  ;;  %v1081_v54 = vadd.f32 %v1079_v49, %v607_v38 }
 0x38c   : > { %1083 = vmax.xlane.f32.xlu1 %v1082_v52 }
 0x38d   : > { %v1085_v58 = vsel %vm954_vm1, %v1081_v54, -inf }
 0x38e   : > { %v1198_v55 = vpop.f32.mrb[12].mxu0 }
 0x38f   : > { %v1205_v56 = vmul.f32 0.17677669, %v1198_v55  ;;  %v2592_v57 = vpop.f32.mrb[13].mxu0 }
 0x390   : > { %1086 = vmax.xlane.f32.xlu1 %v1085_v58  ;;  %v1201_v59 = vpop.f32.mrb[14].mxu0 }
 0x391   : > { %v1206_v60 = vmul.f32 0.17677669, %v1201_v59  ;;  %v2593_v61 = vpop.f32.mrb[15].mxu0  ;;  %v1207_v62 = vadd.f32 %v1205_v56, %v606_v34 }
 0x393   : > { %v1209_v63 = vsel %vm954_vm1, %v1207_v62, -inf  ;;  %v1208_v0 = vadd.f32 %v1206_v60, %v607_v38 }
 0x394   : > { %1210 = vmax.xlane.f32.xlu1 %v1209_v63 }
 0x395   : > { %v1212_v6 = vsel %vm954_vm1, %v1208_v0, -inf }
 0x396   : > { %v1325_v1 = vpop.f32.mrb[16].mxu0 }
 0x397   : > { %v1332_v2 = vmul.f32 0.17677669, %v1325_v1  ;;  %v2604_v5 = vpop.f32.mrb[17].mxu0 }
 0x398   : > { %1213 = vmax.xlane.f32.xlu1 %v1212_v6  ;;  %v1328_v8 = vpop.f32.mrb[18].mxu0 }
 0x399   : > { %v1333_v9 = vmul.f32 0.17677669, %v1328_v8  ;;  %v2605_v10 = vpop.f32.mrb[19].mxu0  ;;  %v1334_v11 = vadd.f32 %v1332_v2, %v606_v34 }
 0x39b   : > { %v1336_v13 = vsel %vm954_vm1, %v1334_v11, -inf  ;;  %v1335_v14 = vadd.f32 %v1333_v9, %v607_v38 }
 0x39c   : > { %1337 = vmax.xlane.f32.xlu0 %v1336_v13 }
 0x39d   : > { %v1339_v15 = vsel %vm954_vm1, %v1335_v14, -inf }
 0x39e   : > { %1340 = vmax.xlane.f32.xlu1 %v1339_v15 }
 0x411   : > { %v957_v19 = vpop.xlane.xlu1 %956 }
 0x412   : > { %v961_v20 = vsub.f32 %v952_v41, %v957_v19 }
 0x413   : > { %v960_v21 = vpop.xlane.xlu0 %959 }
 0x414   : > { %v963_v22 = vmul.f32 1.442695, %v961_v20  ;;  %v962_v23 = vsub.f32 %v953_v43, %v960_v21 }
 0x416   : > { %2815 = vpow2.f32 %v963_v22  ;;  %v965_v24 = vmul.f32 1.442695, %v962_v23 }
 0x418   : > { %2817 = vpow2.f32 %v965_v24 }
 0x419   : > { %v1084_v25 = vpop.xlane.xlu1 %1083 }
 0x41a   : > { %v1088_v26 = vsub.f32 %v1080_v51, %v1084_v25 }
 0x41c   : > { %v1090_v27 = vmul.f32 1.442695, %v1088_v26 }
 0x41d   : > { %v1087_v28 = vpop.xlane.xlu1 %1086 }
 0x41e   : > { %2819 = vpow2.f32 %v1090_v27  ;;  %v1089_v30 = vsub.f32 %v1081_v54, %v1087_v28 }
 0x420   : > { %v2816_v31 = vpop.eup %2815  ;;  %v1092_v32 = vmul.f32 1.442695, %v1089_v30 }
 0x421   : > { %v1211_v33 = vpop.xlane.xlu1 %1210  ;;  %v967_v34 = vsel %vm954_vm1, %v2816_v31, 0.0 }
 0x422   : > { %v2818_v35 = vpop.eup %2817  ;;  %2821 = vpow2.f32 %v1092_v32  ;;  %v1215_v36 = vsub.f32 %v1207_v62, %v1211_v33  ;;  %968 = vadd.xlane.f32.xlu0 %v967_v34  ;;  %v2739_v33 = vld [vmem:[%s3374_s1] sm:$0xff]   ;;  %v2740_v34 = vld [vmem:[%s3374_s1 + $0x8] sm:$0xff]  }
 0x423   : > { %v970_v37 = vsel %vm954_vm1, %v2818_v35, 0.0  ;;  %2613 = vmatpush3.bf16.msra.mxu0 %v2739_v33  ;;  %v2773_v33 = vld [vmem:[%s3356_s19 + $0x84] ss:$16 sps:$4 sm:$0xff]  }
 0x424   : > { %v1217_v38 = vmul.f32 1.442695, %v1215_v36  ;;  %971 = vadd.xlane.f32.xlu1 %v970_v37  ;;  %2614 = vmatprep.subr.bf16.mxu0 %v3095_v7  ;;  %v2743_v36 = vld [vmem:[%s3374_s1 + $0x20] sm:$0xff]   ;;  %v2744_v37 = vld [vmem:[%s3374_s1 + $0x28] sm:$0xff]  }
 0x425   : > { %v1214_v39 = vpop.xlane.xlu1 %1213 }
 0x426   : > { %2823 = vpow2.f32 %v1217_v38  ;;  %v1216_v40 = vsub.f32 %v1208_v0, %v1214_v39  ;;  %v2745_v38 = vld [vmem:[%s3374_s1 + $0x30] sm:$0xff]   ;;  %v2746_v39 = vld [vmem:[%s3374_s1 + $0x38] sm:$0xff]  }
 0x427   : > { %2615 = vmatpush3.bf16.msra.mxu0 %v2740_v34  ;;  %v2774_v34 = vld [vmem:[%s3356_s19 + $0x88] ss:$16 sps:$4 sm:$0xff]  }
 0x428   : > { %v2820_v41 = vpop.eup %2819  ;;  %v1219_v42 = vmul.f32 1.442695, %v1216_v40  ;;  %2616 = vmatprep.subr.bf16.mxu0 %v3095_v7 }
 0x429   : > { %v1338_v43 = vpop.xlane.xlu0 %1337  ;;  %v1094_v44 = vsel %vm954_vm1, %v2820_v41, 0.0 }
 0x42a   : > { %2825 = vpow2.f32 %v1219_v42  ;;  %v1342_v45 = vsub.f32 %v1334_v11, %v1338_v43  ;;  %1095 = vadd.xlane.f32.xlu0 %v1094_v44 }
 0x42b   : > { %v1341_v46 = vpop.xlane.xlu1 %1340 }
 0x42c   : > { %v2822_v47 = vpop.eup %2821  ;;  %v1344_v48 = vmul.f32 1.442695, %v1342_v45  ;;  %v1343_v49 = vsub.f32 %v1335_v14, %v1341_v46 }
 0x42d   : > { %v1097_v50 = vsel %vm954_vm1, %v2822_v47, 0.0 }
 0x42e   : > { %2827 = vpow2.f32 %v1344_v48  ;;  %v1346_v51 = vmul.f32 1.442695, %v1343_v49  ;;  %1098 = vadd.xlane.f32.xlu1 %v1097_v50 }
 0x430   : > { %v2824_v52 = vpop.eup %2823  ;;  %2829 = vpow2.f32 %v1346_v51 }
 0x431   : > { %v1221_v54 = vsel %vm954_vm1, %v2824_v52, 0.0 }
 0x432   : > { %1222 = vadd.xlane.f32.xlu0 %v1221_v54 }
 0x434   : > { %v2826_v55 = vpop.eup %2825 }
 0x435   : > { %v1224_v56 = vsel %vm954_vm1, %v2826_v55, 0.0 }
 0x436   : > { %1225 = vadd.xlane.f32.xlu1 %v1224_v56 }
 0x438   : > { %v2828_v57 = vpop.eup %2827 }
 0x439   : > { %v1348_v58 = vsel %vm954_vm1, %v2828_v57, 0.0 }
 0x43a   : > { %v2830_v59 = vpop.eup %2829  ;;  %1349 = vadd.xlane.f32.xlu0 %v1348_v58 }
 0x43b   : > { %v1351_v60 = vsel %vm954_vm1, %v2830_v59, 0.0 }
 0x43c   : > { %1352 = vadd.xlane.f32.xlu1 %v1351_v60 }
 0x4af   : > { %v969_v61 = vpop.xlane.xlu0 %968 }
 0x4b0   : > { %2831 = vrcp.f32 %v969_v61 }
 0x4b1   : > { %v972_v62 = vpop.xlane.xlu1 %971 }
 0x4b2   : > { %2833 = vrcp.f32 %v972_v62 }
 0x4b7   : > { %v1096_v63 = vpop.xlane.xlu0 %1095 }
 0x4b8   : > { %2835 = vrcp.f32 %v1096_v63 }
 0x4ba   : > { %v2832_v0 = vpop.eup %2831 }
 0x4bb   : > { %v1099_v1 = vpop.xlane.xlu1 %1098  ;;  %v975_v5 = vmul.f32 %v2832_v0, %v2816_v31 }
 0x4bc   : > { %v2834_v2 = vpop.eup %2833  ;;  %2837 = vrcp.f32 %v1099_v1 }
 0x4bd   : > { %v976_v6 = vmul.f32 %v2834_v2, %v2818_v35  ;;  %v2742_v35 = vld [vmem:[%s3374_s1 + $0x18] sm:$0xff]  }
 0x4bf   : > { %v1223_v8 = vpop.xlane.xlu0 %1222  ;;  %v977_v9 = vpack.c.bf16 %v976_v6, %v975_v5 }
 0x4c0   : > { %2839 = vrcp.f32 %v1223_v8  ;;  %v2749_v8 = vld [vmem:[%s3356_s19 + $0x4] ss:$16 sps:$4 sm:$0xff]  }
 0x4c1   : > { %2573 = vmatmul.mubr.msk.bf16.vlgmr.msra.gmra.mrb[4].mxu1 %vm954_vm1, %v977_v9  ;;  %v2750_v9 = vld [vmem:[%s3356_s19 + $0x8] ss:$16 sps:$4 sm:$0xff]  }
 0x4c2   : > { %2583 = vmatpush3.bf16.msra.mxu1 %v3446_v53  ;;  %2584 = vmatprep.mubr.msk.bf16.mxu1 %vm3097_vm0, %v3095_v7  ;;  %v2836_v11 = vpop.eup %2835 }
 0x4c3   : > { %v1226_v10 = vpop.xlane.xlu1 %1225  ;;  %2594 = vmatprep.subr.bf16.mxu1 %v3095_v7  ;;  %v1102_v14 = vmul.f32 %v2836_v11, %v2820_v41  ;;  %v2755_v11 = vld [vmem:[%s3356_s19 + $0x24] ss:$16 sps:$4 sm:$0xff]  }
 0x4c4   : > { %2841 = vrcp.f32 %v1226_v10  ;;  %v2752_v10 = vld [vmem:[%s3356_s19 + $0xc] ss:$16 sps:$4 sm:$0xff]  }
 0x4c6   : > { %v2838_v13 = vpop.eup %2837 }
 0x4c7   : > { %v1103_v15 = vmul.f32 %v2838_v13, %v2822_v47  ;;  %v1350_v19 = vpop.xlane.xlu0 %1349  ;;  %v2758_v13 = vld [vmem:[%s3356_s19 + $0x2c] ss:$16 sps:$4 sm:$0xff]  }
 0x4c8   : > { %2843 = vrcp.f32 %v1350_v19  ;;  %v2764_v19 = vld [vmem:[%s3356_s19 + $0x4c] ss:$16 sps:$4 sm:$0xff]  }
 0x4c9   : > { %v1353_v20 = vpop.xlane.xlu1 %1352  ;;  %v1104_v21 = vpack.c.bf16 %v1103_v15, %v1102_v14  ;;  %v2756_v14 = vld [vmem:[%s3356_s19 + $0x28] ss:$16 sps:$4 sm:$0xff]   ;;  %v2761_v15 = vld [vmem:[%s3356_s19 + $0x44] ss:$16 sps:$4 sm:$0xff]  }
 0x4ca   : > { %2845 = vrcp.f32 %v1353_v20  ;;  %v2840_v22 = vpop.eup %2839  ;;  %v2762_v20 = vld [vmem:[%s3356_s19 + $0x48] ss:$16 sps:$4 sm:$0xff]  }
 0x4cb   : > { %2585 = vmatmul.mubr.msk.bf16.vlgmr.msra.gmra.mrb[8].mxu1 %vm954_vm1, %v1104_v21  ;;  %v1229_v24 = vmul.f32 %v2840_v22, %v2824_v52 }
 0x4cc   : > { %2595 = vmatpush3.bf16.msra.mxu1 %v3446_v53  ;;  %2596 = vmatprep.mubr.msk.bf16.mxu1 %vm3097_vm0, %v3095_v7 }
 0x4cd   : > { %2606 = vmatprep.subr.bf16.mxu1 %v3095_v7 }
 0x4ce   : > { %v2842_v23 = vpop.eup %2841 }
 0x4cf   : > { %v1230_v25 = vmul.f32 %v2842_v23, %v2826_v55 }
 0x4d1   : > { %v1231_v26 = vpack.c.bf16 %v1230_v25, %v1229_v24 }
 0x4d2   : > { %v2844_v27 = vpop.eup %2843 }
 0x4d3   : > { %2597 = vmatmul.mubr.msk.bf16.vlgmr.msra.gmra.mrb[12].mxu1 %vm954_vm1, %v1231_v26  ;;  %v1356_v31 = vmul.f32 %v2844_v27, %v2828_v57 }
 0x4d4   : > { %v2846_v28 = vpop.eup %2845  ;;  %2607 = vmatpush3.bf16.msra.mxu1 %v3446_v53  ;;  %2608 = vmatprep.mubr.msk.bf16.mxu1 %vm3097_vm0, %v3095_v7  ;;  %v2741_v53 = vld [vmem:[%s3374_s1 + $0x10] sm:$0xff]  }
 0x4d5   : > { %v1357_v30 = vmul.f32 %v2846_v28, %v2830_v59  ;;  %2617 = vmatpush3.bf16.msra.mxu0 %v2741_v53  ;;  %1731 = vmatprep.subr.bf16.mxu1 %v2749_v8  ;;  %v2776_v53 = vld [vmem:[%s3356_s19 + $0x8c] ss:$16 sps:$4 sm:$0xff]  }
 0x4d6   : > { %2618 = vmatprep.subr.bf16.mxu0 %v3095_v7  ;;  %v2806_v8 = vld [vmem:[%s3380_s16 + $0x28] sm:$0xff]  }
 0x4d7   : > { %v1358_v32 = vpack.c.bf16 %v1357_v30, %v1356_v31  ;;  %v2770_v30 = vld [vmem:[%s3356_s19 + $0x6c] ss:$16 sps:$4 sm:$0xff]   ;;  %v2765_v31 = vld [vmem:[%s3356_s19 + $0x60] ss:$16 sps:$4 sm:$0xff]  }
 0x4d9   : > { %2619 = vmatpush3.bf16.msra.mxu0 %v2742_v35  ;;  %v2779_v35 = vld [vmem:[%s3356_s19 + $0xa4] ss:$16 sps:$4 sm:$0xff]  }
 0x4da   : > { %2620 = vmatprep.subr.bf16.mxu0 %v3095_v7 }
 0x4db   : > { %2609 = vmatmul.mubr.msk.bf16.vlgmr.msra.gmra.mrb[16].mxu1 %vm954_vm1, %v1358_v32  ;;  %v2768_v32 = vld [vmem:[%s3356_s19 + $0x68] ss:$16 sps:$4 sm:$0xff]  }
 0x4dc   : > { %1763 = vmatprep.mubr.bf16.mxu1 %v3096_v29 }
 0x4dd   : > { %2621 = vmatpush3.bf16.msra.mxu0 %v2743_v36  ;;  %v2782_v36 = vld [vmem:[%s3356_s19 + $0xac] ss:$16 sps:$4 sm:$0xff]  }
 0x4de   : > { %2622 = vmatprep.subr.bf16.mxu0 %v3095_v7 }
 0x4e1   : > { %2623 = vmatpush3.bf16.msra.mxu0 %v2744_v37  ;;  %v2777_v37 = vld [vmem:[%s3356_s19 + $0xa0] ss:$16 sps:$4 sm:$0xff]  }
 0x4e2   : > { %2624 = vmatprep.subr.bf16.mxu0 %v3095_v7 }
 0x4e5   : > { %2625 = vmatpush3.bf16.msra.mxu0 %v2745_v38  ;;  %v2780_v38 = vld [vmem:[%s3356_s19 + $0xa8] ss:$16 sps:$4 sm:$0xff]  }
 0x4e6   : > { %2626 = vmatprep.subr.bf16.mxu0 %v3095_v7 }
 0x4e9   : > { %2627 = vmatpush3.bf16.msra.mxu0 %v2746_v39  ;;  %v2785_v39 = vld [vmem:[%s3356_s19 + $0xc4] ss:$16 sps:$4 sm:$0xff]  }
 0x4ea   : > { %1774 = vmatprep.subr.bf16.mxu0 %v2752_v10  ;;  %v2808_v10 = vld [vmem:[%s3380_s16 + $0x30] sm:$0xff]  }
 0x594   : > { %v1015_v40 = vpop.f32.mrb[4].mxu1 }
 0x595   : > { %v2574_v41 = vpop.f32.mrb[5].mxu1  ;;  %v1022_v45 = vmul.f32 %v3465_v12, %v1015_v40  ;;  %v2788_v40 = vld [vmem:[%s3356_s19 + $0xcc] ss:$16 sps:$4 sm:$0xff]  }
 0x596   : > { %v1018_v42 = vpop.f32.mrb[6].mxu1  ;;  %v2783_v41 = vld [vmem:[%s3356_s19 + $0xc0] ss:$16 sps:$4 sm:$0xff]  }
 0x597   : > { %v2575_v43 = vpop.f32.mrb[7].mxu1  ;;  %v1023_v49 = vmul.f32 %v3465_v12, %v1018_v42  ;;  %v2786_v42 = vld [vmem:[%s3356_s19 + $0xc8] ss:$16 sps:$4 sm:$0xff]  }
 0x598   : > { %v2791_v43 = vld [vmem:[%s3356_s19 + $0xe4] ss:$16 sps:$4 sm:$0xff]  }
 0x59e   : > { %v1142_v44 = vpop.f32.mrb[8].mxu1 }
 0x59f   : > { %v1149_v46 = vmul.f32 %v3470_v16, %v1142_v44  ;;  %v2586_v47 = vpop.f32.mrb[9].mxu1  ;;  %v2794_v44 = vld [vmem:[%s3356_s19 + $0xec] ss:$16 sps:$4 sm:$0xff]  }
 0x5a0   : > { %v1145_v48 = vpop.f32.mrb[10].mxu1 }
 0x5a1   : > { %v1151_v50 = vadd.f32 %v1149_v46, %v1022_v45  ;;  %v1150_v51 = vmul.f32 %v3470_v16, %v1145_v48  ;;  %v2587_v52 = vpop.f32.mrb[11].mxu1  ;;  %v2789_v45 = vld [vmem:[%s3356_s19 + $0xe0] ss:$16 sps:$4 sm:$0xff]   ;;  %v2792_v46 = vld [vmem:[%s3356_s19 + $0xe8] ss:$16 sps:$4 sm:$0xff]  }
 0x5a3   : > { %v1152_v7 = vadd.f32 %v1150_v51, %v1023_v49 }
 0x5a6   : > { %v1269_v54 = vpop.f32.mrb[12].mxu1 }
 0x5a7   : > { %v1276_v55 = vmul.f32 %v3475_v17, %v1269_v54  ;;  %v2598_v56 = vpop.f32.mrb[13].mxu1 }
 0x5a8   : > { %v1272_v57 = vpop.f32.mrb[14].mxu1  ;;  %v2409_v56 = vld [vmem:[%s583_s17] ss:$0 sm:$0xff] }
 0x5a9   : > { %v1278_v58 = vadd.f32 %v1276_v55, %v1151_v50  ;;  %v1277_v59 = vmul.f32 %v3475_v17, %v1272_v57  ;;  %v2599_v60 = vpop.f32.mrb[15].mxu1  ;;  %v2747_v17 = vld [vmem:[%s3356_s19] ss:$16 sps:$4 sm:$0xff]  }
 0x5aa   : > { %1732 = vmatpush1.bf16.msra.mxu1 %v2747_v17  ;;  %v2805_v17 = vld [vmem:[%s3380_s16 + $0x68] sm:$0xff]  }
 0x5ab   : > { %v1279_v61 = vadd.f32 %v1277_v59, %v1152_v7  ;;  %1733 = vmatprep.subr.bf16.mxu1 %v2755_v11  ;;  %v2809_v11 = vld [vmem:[%s3380_s16 + $0x78] sm:$0xff]  }
 0x5ae   : > { %v1396_v12 = vpop.f32.mrb[16].mxu1 }
 0x5af   : > { %v1403_v16 = vmul.f32 %v3480_v18, %v1396_v12  ;;  %v2610_v62 = vpop.f32.mrb[17].mxu1  ;;  %v2796_v12 = vld [vmem:[%s3380_s16] sm:$0xff]  }
 0x5b0   : > { %v1399_v63 = vpop.f32.mrb[18].mxu1  ;;  %v2798_v62 = vld [vmem:[%s3380_s16 + $0x8] sm:$0xff]  }
 0x5b1   : > { %v1405_v0 = vadd.f32 %v1403_v16, %v1278_v58  ;;  %v1404_v1 = vmul.f32 %v3480_v18, %v1399_v63  ;;  %v2611_v2 = vpop.f32.mrb[19].mxu1  ;;  %v2753_v18 = vld [vmem:[%s3356_s19 + $0x20] ss:$16 sps:$4 sm:$0xff]   ;;  %v2797_v16 = vld [vmem:[%s3380_s16 + $0x48] sm:$0xff]  }
 0x5b2   : > { %1734 = vmatpush1.bf16.msra.mxu1 %v2753_v18  ;;  %v2799_v63 = vld [vmem:[%s3380_s16 + $0x50] sm:$0xff]   ;;  %v2802_v2 = vld [vmem:[%s3380_s16 + $0x18] sm:$0xff]  }
 0x5b3   : > { %v1406_v5 = vadd.f32 %v1404_v1, %v1279_v61  ;;  %1735 = vmatprep.subr.bf16.mxu1 %v2761_v15  ;;  %v2795_v61 = vld [vmem:[%s3380_s16 + $0x40] sm:$0xff]   ;;  %v2801_v1 = vld [vmem:[%s3380_s16 + $0x58] sm:$0xff]  }
 0x5b5   : > { %v1407_v6 = vpack.c.bf16 %v1406_v5, %v1405_v0  ;;  %v2800_v0 = vld [vmem:[%s3380_s16 + $0x10] sm:$0xff]   ;;  %v2803_v5 = vld [vmem:[%s3380_s16 + $0x60] sm:$0xff]  }
 0x5b7   : > { %2629 = vmatmul.mubr.bf16.vlgmr.msra.gmra.mrb[20].mxu0 %v1407_v6  ;;  %v2804_v6 = vld [vmem:[%s3380_s16 + $0x20] sm:$0xff]  }
 0x5b8   : > { %1806 = vmatprep.mubr.bf16.mxu0 %v3096_v29  ;;  %1775 = vmatpush1.bf16.msra.mxu0 %v2750_v9  ;;  %v2759_v29 = vld [vmem:[%s3356_s19 + $0x40] ss:$16 sps:$4 sm:$0xff]  }
 0x5b9   : > { %1776 = vmatprep.subr.bf16.mxu0 %v2758_v13  ;;  %1736 = vmatpush1.bf16.msra.mxu1 %v2759_v29  ;;  %v2807_v9 = vld [vmem:[%s3380_s16 + $0x70] sm:$0xff]   ;;  %v2810_v13 = vld [vmem:[%s3380_s16 + $0x38] sm:$0xff]  }
 0x5bc   : > { %1777 = vmatpush1.bf16.msra.mxu0 %v2756_v14 }
 0x5bd   : > { %1778 = vmatprep.subr.bf16.mxu0 %v2764_v19 }
 0x5c0   : > { %1779 = vmatpush1.bf16.msra.mxu0 %v2762_v20 }
 0x5c1   : > { %1780 = vmatprep.subr.bf16.mxu0 %v2770_v30 }
 0x5c4   : > { %1781 = vmatpush1.bf16.msra.mxu0 %v2768_v32 }
 0x5c5   : > { %1782 = vmatprep.subr.bf16.mxu0 %v2776_v53 }
 0x5c8   : > { %1783 = vmatpush1.bf16.msra.mxu0 %v2774_v34 }
 0x5c9   : > { %1784 = vmatprep.subr.bf16.mxu0 %v2782_v36 }
 0x5cc   : > { %1785 = vmatpush1.bf16.msra.mxu0 %v2780_v38 }
 0x5cd   : > { %1786 = vmatprep.subr.bf16.mxu0 %v2788_v40 }
 0x5d0   : > { %1787 = vmatpush1.bf16.msra.mxu0 %v2786_v42 }
 0x5d1   : > { %1788 = vmatprep.subr.bf16.mxu0 %v2794_v44 }
 0x5d4   : > { %1789 = vmatpush1.bf16.msra.mxu0 %v2792_v46 }
 0x68a   : > { %v1506_v21 = vpop.f32.mrb[20].mxu0 }
 0x68b   : > { %v3577_v22 = vadd.f32 %v1506_v21, %v3390_v3  ;;  %v2630_v23 = vpop.f32.mrb[21].mxu0  ;;  %v2767_v3 = vld [vmem:[%s3356_s19 + $0x64] ss:$16 sps:$4 sm:$0xff]  }
 0x68c   : > { %v1509_v24 = vpop.f32.mrb[22].mxu0  ;;  %1737 = vmatprep.subr.bf16.mxu1 %v2767_v3 }
 0x68d   : > { %v3580_v25 = vadd.f32 %v1509_v24, %v3392_v4  ;;  %v2631_v26 = vpop.f32.mrb[23].mxu0  ;;  %v1516_v27 = vmul.f32 %v3577_v22, %v3577_v22  ;;  %1738 = vmatpush1.bf16.msra.mxu1 %v2765_v31  ;;  %v2771_v4 = vld [vmem:[%s3356_s19 + $0x80] ss:$16 sps:$4 sm:$0xff]  }
 0x68e   : > { %1739 = vmatprep.subr.bf16.mxu1 %v2773_v33 }
 0x68f   : > { %1518 = vadd.xlane.f32.xlu0 %v1516_v27  ;;  %v1517_v28 = vmul.f32 %v3580_v25, %v3580_v25 }
 0x691   : > { %1520 = vadd.xlane.f32.xlu1 %v1517_v28  ;;  %1740 = vmatpush1.bf16.msra.mxu1 %v2771_v4 }
 0x692   : > { %1741 = vmatprep.subr.bf16.mxu1 %v2779_v35 }
 0x695   : > { %1742 = vmatpush1.bf16.msra.mxu1 %v2777_v37 }
 0x696   : > { %1743 = vmatprep.subr.bf16.mxu1 %v2785_v39 }
 0x699   : > { %1744 = vmatpush1.bf16.msra.mxu1 %v2783_v41 }
 0x69a   : > { %1745 = vmatprep.subr.bf16.mxu1 %v2791_v43 }
 0x69d   : > { %1746 = vmatpush1.bf16.msra.mxu1 %v2789_v45 }
 0x69e   : > { %2522 = vmatprep.subr.bf16.mxu1 %v2795_v61 }
 0x71c   : > { %v1519_v47 = vpop.xlane.xlu0 %1518 }
 0x71d   : > { %v1522_v48 = vmul.f32 0.0078125, %v1519_v47 }
 0x71e   : > { %v1521_v49 = vpop.xlane.xlu1 %1520 }
 0x71f   : > { %v1524_v50 = vadd.f32 1e-06, %v1522_v48  ;;  %v1523_v51 = vmul.f32 0.0078125, %v1521_v49 }
 0x721   : > { %2847 = vrsqrt.f32 %v1524_v50  ;;  %v1525_v52 = vadd.f32 1e-06, %v1523_v51 }
 0x723   : > { %2849 = vrsqrt.f32 %v1525_v52 }
 0x72b   : > { %v2848_v7 = vpop.eup %2847 }
 0x72c   : > { %v1528_v54 = vmul.f32 %v2848_v7, %v3577_v22 }
 0x72d   : > { %v2850_v55 = vpop.eup %2849 }
 0x72e   : > { %v1529_v57 = vmul.f32 %v2850_v55, %v3580_v25  ;;  %v1536_v58 = vmul.f32 %v2409_v56, %v1528_v54 }
 0x730   : > { %v1537_v59 = vmul.f32 %v2409_v56, %v1529_v57  ;;  %v2022_v56 = vld [vmem:[#allocation3] sm:$0xff]  ;;  %v2867_v57 = vld [vmem:[#allocation2] sm:$0xff] }
 0x732   : > { %v1538_v60 = vpack.c.bf16 %v1537_v59, %v1536_v58 }
 0x734   : > { %1764 = vmatmul.mubr.bf16.vlgmr.msra.gmra.mrb[20].mxu1 %v1538_v60  ;;  %1807 = vmatmul.mubr.bf16.vlgmr.msra.gmra.mrb[24].mxu0 %v1538_v60  ;;  %v2023_v60 = vld [vmem:[#allocation3 + $0x8] sm:$0xff] }
 0x735   : > { %2523 = vmatpush3.bf16.msra.mxu1 %v2796_v12  ;;  %v2868_v12 = vld [vmem:[#allocation2 + $0x8] sm:$0xff] }
 0x736   : > { %2524 = vmatprep.subr.bf16.mxu1 %v2797_v16 }
 0x739   : > { %2525 = vmatpush3.bf16.msra.mxu1 %v2798_v62 }
 0x73a   : > { %2526 = vmatprep.subr.bf16.mxu1 %v2799_v63  ;;  %v2035_v63 = vld [vmem:[#allocation2] sm:$0xff] (!%p2462_p11) }
 0x73d   : > { %2527 = vmatpush3.bf16.msra.mxu1 %v2800_v0 }
 0x73e   : > { %2528 = vmatprep.subr.bf16.mxu1 %v2801_v1  ;;  %v2036_v1 = vld [vmem:[#allocation2 + $0x8] sm:$0xff] (!%p2462_p11) }
 0x741   : > { %2529 = vmatpush3.bf16.msra.mxu1 %v2802_v2 }
 0x742   : > { %2530 = vmatprep.subr.bf16.mxu1 %v2803_v5 }
 0x745   : > { %2531 = vmatpush3.bf16.msra.mxu1 %v2804_v6 }
 0x746   : > { %2532 = vmatprep.subr.bf16.mxu1 %v2805_v17 }
 0x749   : > { %2533 = vmatpush3.bf16.msra.mxu1 %v2806_v8 }
 0x74a   : > { %2534 = vmatprep.subr.bf16.mxu1 %v2807_v9 }
 0x74d   : > { %2535 = vmatpush3.bf16.msra.mxu1 %v2808_v10 }
 0x74e   : > { %2536 = vmatprep.subr.bf16.mxu1 %v2809_v11 }
 0x751   : > { %2537 = vmatpush3.bf16.msra.mxu1 %v2810_v13 }
 0x807   : > { %v1765_v18 = vpop.f32.mrb[20].mxu1  ;;  %v1808_v14 = vpop.f32.mrb[24].mxu0 }
 0x808   : > { %v2442_v15 = vmul.f32 -1.442695, %v1765_v18  ;;  %v1767_v19 = vpop.f32.mrb[21].mxu1  ;;  %v1810_v29 = vpop.f32.mrb[25].mxu0 }
 0x809   : > { %v2443_v20 = vmul.f32 -1.442695, %v1767_v19  ;;  %v1769_v21 = vpop.f32.mrb[22].mxu1  ;;  %v1812_v23 = vpop.f32.mrb[26].mxu0 }
 0x80a   : > { %2851 = vpow2.f32 %v2442_v15  ;;  %v2444_v24 = vmul.f32 -1.442695, %v1769_v21  ;;  %v1771_v26 = vpop.f32.mrb[23].mxu1  ;;  %v1814_v27 = vpop.f32.mrb[27].mxu0 }
 0x80b   : > { %2853 = vpow2.f32 %v2443_v20  ;;  %v2445_v28 = vmul.f32 -1.442695, %v1771_v26 }
 0x80c   : > { %2855 = vpow2.f32 %v2444_v24 }
 0x80d   : > { %2857 = vpow2.f32 %v2445_v28 }
 0x814   : > { %v2852_v3 = vpop.eup %2851 }
 0x815   : > { %v2854_v30 = vpop.eup %2853  ;;  %v1829_v31 = vadd.f32 1.0, %v2852_v3 }
 0x816   : > { %v2856_v32 = vpop.eup %2855  ;;  %v1830_v4 = vadd.f32 1.0, %v2854_v30 }
 0x817   : > { %v2858_v33 = vpop.eup %2857  ;;  %2859 = vrcp.f32 %v1829_v31  ;;  %v1831_v34 = vadd.f32 1.0, %v2856_v32 }
 0x818   : > { %2861 = vrcp.f32 %v1830_v4  ;;  %v1832_v53 = vadd.f32 1.0, %v2858_v33 }
 0x819   : > { %2863 = vrcp.f32 %v1831_v34 }
 0x81a   : > { %2865 = vrcp.f32 %v1832_v53 }
 0x821   : > { %v2860_v35 = vpop.eup %2859 }
 0x822   : > { %v2862_v36 = vpop.eup %2861  ;;  %v1841_v37 = vmul.f32 %v2860_v35, %v1765_v18 }
 0x823   : > { %v2864_v38 = vpop.eup %2863  ;;  %v1842_v39 = vmul.f32 %v2862_v36, %v1767_v19 }
 0x824   : > { %v2866_v40 = vpop.eup %2865  ;;  %v1845_v41 = vmul.f32 %v1841_v37, %v1808_v14  ;;  %v1843_v42 = vmul.f32 %v2864_v38, %v1769_v21 }
 0x825   : > { %v1846_v43 = vmul.f32 %v1842_v39, %v1810_v29  ;;  %v1844_v44 = vmul.f32 %v2866_v40, %v1771_v26 }
 0x826   : > { %v1847_v45 = vmul.f32 %v1843_v42, %v1812_v23 }
 0x827   : > { %v1848_v46 = vmul.f32 %v1844_v44, %v1814_v27 }
 0x828   : > { %v1849_v47 = vpack.c.bf16 %v1847_v45, %v1845_v41 }
 0x829   : > { %v1850_v48 = vpack.c.bf16 %v1848_v46, %v1846_v43 }
 0x82b   : > { %2011 = vmatprep.mubr.bf16.mxu1 %v1850_v48 }
 0x82c   : > { %2012 = vmatmul.mubr.bf16.vlgmr.msra.gmra.mrb[24].mxu1 %v1849_v47 }
 0x8ff   : > { %v2538_v49 = vpop.f32.mrb[24].mxu1 }
 0x900   : > { %v2539_v50 = vpop.f32.mrb[25].mxu1 }
 0x901   : > { %v2540_v51 = vadd.f32 %v2539_v50, %v2538_v49  ;;  %v2541_v52 = vpop.f32.mrb[26].mxu1 }
 0x902   : > { %v2542_v7 = vpop.f32.mrb[27].mxu1 }
 0x903   : > { %v2020_v54 = vadd.f32 %v2540_v51, %v3577_v22  ;;  %v2543_v55 = vadd.f32 %v2542_v7, %v2541_v52 }
 0x905   : > { %v2024_v58 = vsub.f32 %v2020_v54, %v2867_v57  ;;  %v2021_v59 = vadd.f32 %v2543_v55, %v3580_v25  ;;  %2034 = sbr.rel (%p2462_p11) target bundleno = 2326 (0x916), region = 96 }
 0x907   : > { %v2026_v61 = vadd.f32 %v2024_v58, %v2022_v56  ;;  %v2025_v16 = vsub.f32 %v2021_v59, %v2868_v12 }
 0x909   : > { %2028 = vst [vmem:[#allocation3] sm:$0xff] %v2026_v61  ;;  %v2027_v62 = vadd.f32 %v2025_v16, %v2023_v60 }
 0x90b   : > { %2029 = vst [vmem:[#allocation3 + $0x8] sm:$0xff] %v2027_v62 }
 0x910   : > { %v2037_v0 = vld [vmem:[#allocation3] sm:$0xff] }
 0x911   : > { %v2039_v2 = vadd.f32 %v2037_v0, %v2035_v63 }
 0x912   : > { %v2038_v22 = vld [vmem:[#allocation3 + $0x8] sm:$0xff] }
 0x913   : > { %v2040_v5 = vadd.f32 %v2038_v22, %v2036_v1  ;;  %2041 = vst [vmem:[#allocation2] sm:$0xff] %v2039_v2 }
 0x915   : > { %2042 = vst [vmem:[#allocation2 + $0x8] sm:$0xff] %v2040_v5 }
 0x916 PF: > { %p2463_p12 = scmp.ne.s32.totalorder %s3208_s30, 5 }
 0x917   : > { %s3758_s20 = sld [smem:[#allocation24_spill]] (!%p2463_p12)  ;;  %v3099_v26 = vmov (!%p2463_p12), 0   ;;  %s3759_s24 = sld [smem:[#allocation23_spill]] (!%p2463_p12) }
 0x918   : > { %2046 = sbr.rel (%p2463_p12) target bundleno = 2716 (0xa9c), region = 100  ;;  %2201 = vmatprep.mubr.bf16.mxu0 (!%p2463_p12), %v3099_v26 }
 0x91a   : > { %v2047_v25 = vld [vmem:[#allocation2] sm:$0xff] (!%p2463_p12) }
 0x91b   : > { %v2050_v17 = vmul.f32 (!%p2463_p12), %v2047_v25, %v2047_v25 }
 0x91c   : > { %v2048_v6 = vld [vmem:[#allocation2 + $0x8] sm:$0xff] (!%p2463_p12) }
 0x91d   : > { %v2869_v8 = vld [vmem:[%s3758_s20 + $0x4] ss:$8 sps:$4 sm:$0xff] (!%p2463_p12)   ;;  %v2871_v9 = vld [vmem:[%s3758_s20] ss:$8 sps:$4 sm:$0xff] (!%p2463_p12)   ;;  %v2872_v10 = vld [vmem:[%s3758_s20 + $0x14] ss:$8 sps:$4 sm:$0xff] (!%p2463_p12)   ;;  %2052 = vadd.xlane.f32.xlu0 (!%p2463_p12), %v2050_v17  ;;  %v2051_v11 = vmul.f32 (!%p2463_p12), %v2048_v6, %v2048_v6 }
 0x91e   : > { %2169 = vmatprep.subr.bf16.mxu0 (!%p2463_p12), %v2869_v8  ;;  %v2874_v13 = vld [vmem:[%s3758_s20 + $0x10] ss:$8 sps:$4 sm:$0xff] (!%p2463_p12)   ;;  %v2875_v18 = vld [vmem:[%s3758_s20 + $0x24] ss:$8 sps:$4 sm:$0xff] (!%p2463_p12)   ;;  %v2877_v14 = vld [vmem:[%s3758_s20 + $0x20] ss:$8 sps:$4 sm:$0xff] (!%p2463_p12)  }
 0x91f   : > { %2170 = vmatpush1.bf16.msra.mxu0 %v2871_v9  ;;  %v2878_v15 = vld [vmem:[%s3758_s20 + $0x34] ss:$8 sps:$4 sm:$0xff]   ;;  %v2880_v19 = vld [vmem:[%s3758_s20 + $0x30] ss:$8 sps:$4 sm:$0xff]   ;;  %v2881_v29 = vld [vmem:[%s3758_s20 + $0x44] ss:$8 sps:$4 sm:$0xff]  }
 0x920   : > { %2171 = vmatprep.subr.bf16.mxu0 %v2872_v10  ;;  %v2883_v20 = vld [vmem:[%s3758_s20 + $0x40] ss:$8 sps:$4 sm:$0xff]   ;;  %v2884_v21 = vld [vmem:[%s3758_s20 + $0x54] ss:$8 sps:$4 sm:$0xff]   ;;  %v2886_v23 = vld [vmem:[%s3758_s20 + $0x50] ss:$8 sps:$4 sm:$0xff]  }
 0x921   : > { %2054 = vadd.xlane.f32.xlu0 %v2051_v11  ;;  %v2887_v24 = vld [vmem:[%s3758_s20 + $0x64] ss:$8 sps:$4 sm:$0xff]   ;;  %v2889_v27 = vld [vmem:[%s3758_s20 + $0x60] ss:$8 sps:$4 sm:$0xff]   ;;  %v2890_v28 = vld [vmem:[%s3758_s20 + $0x74] ss:$8 sps:$4 sm:$0xff]  }
 0x922   : > { %v2892_v3 = vld [vmem:[%s3758_s20 + $0x70] ss:$8 sps:$4 sm:$0xff]   ;;  %v2464_v37 = vld [vmem:[%s3759_s24] ss:$0 sm:$0xff] }
 0x923   : > { %2172 = vmatpush1.bf16.msra.mxu0 %v2874_v13 }
 0x924   : > { %2173 = vmatprep.subr.bf16.mxu0 %v2875_v18 }
 0x927   : > { %2174 = vmatpush1.bf16.msra.mxu0 %v2877_v14 }
 0x928   : > { %2175 = vmatprep.subr.bf16.mxu0 %v2878_v15 }
 0x92b   : > { %2176 = vmatpush1.bf16.msra.mxu0 %v2880_v19 }
 0x92c   : > { %2177 = vmatprep.subr.bf16.mxu0 %v2881_v29 }
 0x92f   : > { %2178 = vmatpush1.bf16.msra.mxu0 %v2883_v20 }
 0x930   : > { %2179 = vmatprep.subr.bf16.mxu0 %v2884_v21 }
 0x933   : > { %2180 = vmatpush1.bf16.msra.mxu0 %v2886_v23 }
 0x934   : > { %2181 = vmatprep.subr.bf16.mxu0 %v2887_v24 }
 0x937   : > { %2182 = vmatpush1.bf16.msra.mxu0 %v2889_v27 }
 0x938   : > { %2183 = vmatprep.subr.bf16.mxu0 %v2890_v28 }
 0x93b   : > { %2184 = vmatpush1.bf16.msra.mxu0 %v2892_v3 }
 0x9aa   : > { %v2053_v30 = vpop.xlane.xlu0 %2052 }
 0x9ab   : > { %v2056_v31 = vmul.f32 0.0078125, %v2053_v30 }
 0x9ad   : > { %v2058_v32 = vadd.f32 1e-06, %v2056_v31 }
 0x9ae   : > { %v2055_v4 = vpop.xlane.xlu0 %2054 }
 0x9af   : > { %2893 = vrsqrt.f32 %v2058_v32  ;;  %v2057_v33 = vmul.f32 0.0078125, %v2055_v4 }
 0x9b1   : > { %v2059_v34 = vadd.f32 1e-06, %v2057_v33 }
 0x9b3   : > { %2895 = vrsqrt.f32 %v2059_v34 }
 0x9b9   : > { %v2894_v53 = vpop.eup %2893 }
 0x9ba   : > { %v2062_v35 = vmul.f32 %v2894_v53, %v2047_v25 }
 0x9bc   : > { %v2070_v39 = vmul.f32 %v2464_v37, %v2062_v35 }
 0x9bd   : > { %v2896_v36 = vpop.eup %2895 }
 0x9be   : > { %v2063_v38 = vmul.f32 %v2896_v36, %v2048_v6 }
 0x9c0   : > { %v2071_v40 = vmul.f32 %v2464_v37, %v2063_v38 }
 0x9c2   : > { %v2072_v41 = vpack.c.bf16 %v2071_v40, %v2070_v39 }
 0x9c4   : > { %2202 = vmatmul.mubr.bf16.vlgmr.msra.gmra.mrb[0].mxu0 %v2072_v41 }
 0xa97   : > { %v2203_v42 = vpop.f32.mrb[0].mxu0 }
 0xa98   : > { %2212 = vst [vmem:[#allocation13] sm:$0xff] %v2203_v42  ;;  %v2205_v43 = vpop.f32.mrb[1].mxu0 }
 0xa99   : > { %2213 = vst [vmem:[#allocation13 + $0x8] sm:$0xff] %v2205_v43  ;;  %v2207_v44 = vpop.f32.mrb[2].mxu0 }
 0xa9a   : > { %2214 = vst [vmem:[#allocation13 + $0x10] sm:$0xff] %v2207_v44  ;;  %v2209_v45 = vpop.f32.mrb[3].mxu0 }
 0xa9b   : > { %2215 = vst [vmem:[#allocation13 + $0x18] sm:$0xff] %v2209_v45 }
 0xa9c PF: > { %p2656_p13 = scmp.eq.s32.totalorder %s3208_s30, 5  ;;  %s3100_s19 = smov [#allocation13]  }
 0xa9d   : > { %s2222_s1 = sshll.u32 %s3100_s19, 4  ;;  %s2223_s1 = int_to_ptr.vmem [resolvable:$true] %s2222_s1 }
 0xa9e   : > { %s3011_s15 = scalar_lea.vmem %s2223_s1, 512  ;;  %p3018_p0 = scmp.lt.s32.totalorder %s2223_s1, %s2223_s1 }
 0xa9f   : > { %p3012_p1 = scmp.ne.s32.totalorder %s2223_s1, %s3011_s15  ;;  %p3019_p7 = scmp.lt.s32.totalorder %s3011_s15, %s3011_s15 }
 0xaa1   : > { %p3013_p2 = pnand %p3012_p1, %p2656_p13  ;;  %p3020_p9 = por %p3019_p7, %p3018_p0 }
 0xaa3   : > { %p3014_p3 = pneg %p3013_p2 }
 0xaa5   : > { %p3021_p6 = pnand %p3020_p9, %p3014_p3 }
 0xaa7   : > { %3024 = shalt.err (!%p3021_p6)
}
 0xaa8   : > { %s3760_s14 = sld [smem:[#allocation25_spill]] }
 0xaae   : > { %s3025_s28 = scalar_lea.hbm %s3760_s14, 512 }
 0xaaf   : > { %p3026_p5 = scmp.ne.s32.totalorder %s3760_s14, %s3025_s28  ;;  %p3031_p8 = scmp.lt.u32.totalorder %s3025_s28, %s3760_s14 }
 0xab1   : > { %p3027_p4 = pnand %p3026_p5, %p2656_p13 }
 0xab3   : > { %p3028_p10 = pneg %p3027_p4 }
 0xab5   : > { %p3033_p11 = pnand %p3031_p8, %p3028_p10 }
 0xab7   : > { %3036 = shalt.err (!%p3033_p11)
}
 0xab8   : > { %s3101_s11 = smov 256   ;;  %s3102_s23 = smov 16  }
 0xab9   : > { %2642 = dma.vmem_to_hbm [thread:$0]  (%p2656_p13), %s2223_s1, 512, %s3760_s14, [#allocation9], %s3101_s11, %s3101_s11, %s3102_s23  }
 0xaba   : > { %3064 = dma.done.wait (%p2656_p13), [#allocation9], 512  }
 0xabb   : > { %3066 = vsyncadd (%p2656_p13), [#allocation9], 4294966784 }
 0xabc PF: > { %s3761_s29 = sld [smem:[#allocation19_spill]]  ;;  %s3762_s0 = sld [smem:[#allocation18_spill]] }
 0xabd   : > { %s3763_s28 = sld [smem:[#allocation20_spill]]  ;;  %s3764_s1 = smov %s3073_s27 }
 0xac2   : > { %p39_p12 = scmp.ge.s32.totalorder %s3761_s29, 8   ;;  %s3765_s27 = smov %s3762_s0 }
 0xac4   :  { %41 = sbr.rel (!%p39_p12) target bundleno = 34 (0x22), region = 161 }
 0xacb   :  { %2238 = vsyncpa [#allocation8], 1 }
 0xacc   :  { %2240 = vsyncpa [#allocation8 + $0x1], 1 }
 0xacd   :  { %2241 = vsyncpa [#allocation11], 1 }
 0xace   :  { %2243 = vsyncpa [#allocation11 + $0x1], 1 }
 0xacf   :  { %2244 = vsyncpa [#allocation9], 1 }
 0xad0   :  { %2246 = vsyncpa [#allocation9 + $0x1], 1 }

</bundles_post_ra>
